<compile_context>
chip_gen: v6e
topology: v6e:2x2x1
jax: 0.10.0
libtpu: 0.0.40
codegen_flags: <defaults>
</compile_context>

<pallas_src>
import math

import numpy as np

import jax
import jax.numpy as jnp
from jax.experimental import pallas as pl
from jax.experimental.pallas import tpu as pltpu

# Model hyper-parameters (small, consistent with the module's __init__).
D_K = 8
N_HEADS = 4
HDK = N_HEADS * D_K            # 32
D_MODEL = 32
D_FF = 4 * D_MODEL             # 128
EPS = 1e-5                     # torch.nn.LayerNorm default
VEC_SLAB_W = 128               # lane width of the packed bias/LN slab
NEG_INF = -1e30                # additive mask value (finite: avoids inf-inf NaNs)

# Row layout of the packed (8, 128) vector slab.
ROW_BQKV, ROW_BO, ROW_B1, ROW_B2, ROW_G1, ROW_BE1, ROW_G2, ROW_BE2 = range(8)


def _layernorm(x, gamma, beta):
    mu = jnp.mean(x, axis=-1, keepdims=True)
    var = jnp.mean((x - mu) ** 2, axis=-1, keepdims=True)
    return (x - mu) * jax.lax.rsqrt(var + EPS) * gamma + beta


def _gelu_exact(x):
    # torch.nn.GELU() default: exact erf-based GELU.
    return 0.5 * x * (1.0 + jax.lax.erf(x * (1.0 / math.sqrt(2.0))))


def transformer_block_kernel(x_ref, wqkv_ref, wo_ref, w1_ref, w2_ref, vec_ref,
                             bias_ref, o_ref):
    # x_ref holds B_blk flattened sequences: (R, D) with R = B_blk * T rows.
    x = x_ref[...].astype(jnp.float32)

    vecs = vec_ref[...]                         # (8, 128) packed biases / LN params
    b_qkv = vecs[ROW_BQKV:ROW_BQKV + 1, :3 * HDK]   # (1, 96) — Q part pre-scaled
    bo = vecs[ROW_BO:ROW_BO + 1, :D_MODEL]
    b1 = vecs[ROW_B1:ROW_B1 + 1, :D_FF]
    b2 = vecs[ROW_B2:ROW_B2 + 1, :D_MODEL]
    g1 = vecs[ROW_G1:ROW_G1 + 1, :D_MODEL]
    be1 = vecs[ROW_BE1:ROW_BE1 + 1, :D_MODEL]
    g2 = vecs[ROW_G2:ROW_G2 + 1, :D_MODEL]
    be2 = vecs[ROW_BE2:ROW_BE2 + 1, :D_MODEL]

    # ---- MultiHeadAttention(x, x, x), mask=None ---------------------------
    # Fused Q/K/V projection over all B_blk*T rows at once; the 1/sqrt(d_k)
    # score scale is already folded into the Q weight/bias (pack_params).
    qkv = jnp.dot(x, wqkv_ref[...], preferred_element_type=jnp.float32) + b_qkv  # (R, 96)

    def split_heads(m2d):
        # (R, HDK) -> (H, R, D_K). Static column slices + one stack; op count is
        # independent of B_blk, so per-sequence XLU traffic shrinks by B_blk.
        # TODO(synk): single fused relayout (pltpu.einshape) when confirmed safe.
        return jnp.stack(
            [m2d[:, h * D_K:(h + 1) * D_K] for h in range(N_HEADS)], axis=0)

    q = split_heads(qkv[:, :HDK])               # (H, R, D_K)
    k = split_heads(qkv[:, HDK:2 * HDK])
    v = split_heads(qkv[:, 2 * HDK:3 * HDK])

    # Batched scores for all heads & sequences; bias_ref is the host-built
    # block-diagonal (R, R) mask (0 within a sequence, -1e30 across sequences),
    # broadcast over heads, so ONE softmax (one cross-lane max + one cross-lane
    # sum) serves every (sequence, head) pair.
    s = jnp.einsum("hmd,hnd->hmn", q, k,
                   preferred_element_type=jnp.float32)              # (H, R, R)
    s = s + bias_ref[...]
    s = s - jnp.max(s, axis=-1, keepdims=True)
    p = jnp.exp(s)
    p = p * pl.reciprocal(jnp.sum(p, axis=-1, keepdims=True), approx=True)
    ctx = jnp.einsum("hmn,hnd->hmd", p, v,
                     preferred_element_type=jnp.float32)            # (H, R, D_K)
    attn = jnp.concatenate([ctx[h] for h in range(N_HEADS)], axis=-1)  # (R, HDK)

    mha = jnp.dot(attn, wo_ref[...], preferred_element_type=jnp.float32) + bo

    # ---- residual + LayerNorm 1 -------------------------------------------
    # TODO(synk): nn.Dropout layers act as identity (eval mode); training parity
    # would need pltpu.prng_seed / prng_random_bits masking.
    h1 = _layernorm(x + mha, g1, be1)           # (R, D)

    # ---- feed-forward (Linear -> GELU -> Linear) ---------------------------
    ff = jnp.dot(h1, w1_ref[...], preferred_element_type=jnp.float32) + b1
    ff = _gelu_exact(ff)
    ff = jnp.dot(ff, w2_ref[...], preferred_element_type=jnp.float32) + b2

    # ---- residual + LayerNorm 2 -------------------------------------------
    out = _layernorm(h1 + ff, g2, be2)
    # TODO(synk): at real d_model, present a lane-dense (>=128-wide) output slab.
    o_ref[...] = out.astype(o_ref.dtype)


def pack_params(params):
    """Pack 16 small parameter arrays into 5 DMA-friendly slabs (wrapper side)."""
    wq, bq, wk, bk, wv, bv, wo, bo, w1, b1, w2, b2, g1, be1, g2, be2 = params
    scale = 1.0 / math.sqrt(D_K)
    # Fold the attention score scale into the Q projection (weights only,
    # compile-time on a 32x96 tensor — NOT a per-call activation pre-scale).
    w_qkv = jnp.concatenate([wq * scale, wk, wv], axis=1)     # (D, 3*HDK) = (32, 96)
    b_qkv = jnp.concatenate([bq * scale, bk, bv], axis=1)     # (1, 96)

    def pad_row(v):
        return jnp.pad(v, ((0, 0), (0, VEC_SLAB_W - v.shape[1])))

    vec_slab = jnp.concatenate(
        [pad_row(b_qkv), pad_row(bo), pad_row(b1), pad_row(b2),
         pad_row(g1), pad_row(be1), pad_row(g2), pad_row(be2)],
        axis=0)                                               # (8, 128) — one tile
    return w_qkv, wo, w1, w2, vec_slab


def _choose_batch_block(n, t, min_blocks=2, target_rows=256):
    """Sequences per grid step: amortize per-step overhead, but keep >= 2 grid
    blocks when possible so both v7x TensorCores get work, and cap B_blk*T since
    the block-diagonal attention scores scale as (B_blk*T)^2."""
    b = max(1, min(n, target_rows // t))
    if n >= min_blocks:
        b = min(b, n // min_blocks)
    while n % b != 0:          # keep the grid exact (no ragged last block)
        b -= 1
    return b


def transformer_block(x, params, batch_block=None):
    N, T, D = x.shape
    w_qkv, wo, w1, w2, vec_slab = pack_params(params)

    B_blk = _choose_batch_block(N, T) if batch_block is None else batch_block
    assert N % B_blk == 0
    R = B_blk * T
    grid = (N // B_blk,)

    # Host-built block-diagonal additive attention bias (0 within a sequence,
    # -1e30 across sequences); staged into VMEM once like the weights.
    seq_ids = np.arange(R) // T
    attn_bias = jnp.asarray(
        np.where(seq_ids[:, None] == seq_ids[None, :], 0.0, NEG_INF), jnp.float32)

    # Flatten (N, T, D) -> (N*T, D) in the wrapper (free XLA reshape) so the
    # kernel sees plain 2-D row blocks and needs no in-kernel reshapes.
    x2 = x.reshape(N * T, D)

    def const_spec(arr):
        # Full-array block with a constant block index: staged into VMEM once,
        # no re-DMA across grid steps.
        # TODO(synk): pipeline_mode=pl.Buffered(1) here when weights are large.
        return pl.BlockSpec(arr.shape, lambda i: (0, 0))

    row_block = (R, D)
    in_specs = [pl.BlockSpec(row_block, lambda i: (i, 0)),
                const_spec(w_qkv), const_spec(wo), const_spec(w1), const_spec(w2),
                const_spec(vec_slab), const_spec(attn_bias)]
    out_spec = pl.BlockSpec(row_block, lambda i: (i, 0))

    out2 = pl.pallas_call(
        transformer_block_kernel,
        out_shape=jax.ShapeDtypeStruct((N * T, D), x.dtype),
        grid_spec=pltpu.PrefetchScalarGridSpec(
            num_scalar_prefetch=0,
            grid=grid,                       # parallel batch axis: both v7x TCs busy
            in_specs=in_specs,
            out_specs=out_spec,
        ),
        compiler_params=pltpu.CompilerParams(
            dimension_semantics=("parallel",),
            # Headroom for larger B_blk blocks; 32 MiB is safe on v5e/v6e/v7x.
            vmem_limit_bytes=32 * 1024 * 1024,
        ),
    )(x2, w_qkv, wo, w1, w2, vec_slab, attn_bias)
    return out2.reshape(N, T, D)


def init_params(key):
    """Deterministic synthetic parameters (shapes from the module __init__)."""
    ks = jax.random.split(key, 12)

    def lin(kw, kb, fan_in, fan_out):
        w = jax.random.normal(kw, (fan_in, fan_out), jnp.float32) / math.sqrt(fan_in)
        b = 0.01 * jax.random.normal(kb, (1, fan_out), jnp.float32)
        return w, b

    wq, bq = lin(ks[0], ks[1], D_MODEL, HDK)
    wk, bk = lin(ks[2], ks[3], D_MODEL, HDK)
    wv, bv = lin(ks[4], ks[5], D_MODEL, HDK)
    wo, bo = lin(ks[6], ks[7], HDK, D_MODEL)
    w1, b1 = lin(ks[8], ks[9], D_MODEL, D_FF)
    w2, b2 = lin(ks[10], ks[11], D_FF, D_MODEL)
    g1 = jnp.ones((1, D_MODEL), jnp.float32)
    be1 = jnp.zeros((1, D_MODEL), jnp.float32)
    g2 = jnp.ones((1, D_MODEL), jnp.float32)
    be2 = jnp.zeros((1, D_MODEL), jnp.float32)
    return [wq, bq, wk, bk, wv, bv, wo, bo, w1, b1, w2, b2, g1, be1, g2, be2]


def reference(x, params):
    """Pure-JAX reference of the same forward pass (eval mode, no dropout)."""
    wq, bq, wk, bk, wv, bv, wo, bo, w1, b1, w2, b2, g1, be1, g2, be2 = params
    N, T, D = x.shape
    q = (x @ wq + bq).reshape(N, T, N_HEADS, D_K).transpose(0, 2, 1, 3)
    k = (x @ wk + bk).reshape(N, T, N_HEADS, D_K).transpose(0, 2, 1, 3)
    v = (x @ wv + bv).reshape(N, T, N_HEADS, D_K).transpose(0, 2, 1, 3)
    s = jnp.einsum("nhtd,nhsd->nhts", q, k) / math.sqrt(D_K)
    p = jax.nn.softmax(s, axis=-1)
    a = jnp.einsum("nhts,nhsd->nhtd", p, v).transpose(0, 2, 1, 3).reshape(N, T, HDK)
    mha = a @ wo + bo
    h1 = _layernorm(x + mha, g1, be1)
    ff = jax.nn.gelu(h1 @ w1 + b1, approximate=False) @ w2 + b2
    return _layernorm(h1 + ff, g2, be2)


if __name__ == "__main__":
    key = jax.random.PRNGKey(0)
    kx, kp = jax.random.split(key)
    # Small shapes consistent with the module; batch=8 so the multi-sequence
    # block path is exercised (B_blk=4 sequences per step, grid=(2,)).
    N, T = 8, 8
    x = jax.random.normal(kx, (N, T, D_MODEL), jnp.float32)
    params = init_params(kp)

    out = transformer_block(x, params)
    jax.block_until_ready(out)

    ref = reference(x, params)
    assert out.shape == (N, T, D_MODEL)
    assert bool(jnp.all(jnp.isfinite(out)))
    # Exact f32 would match to ~1e-5; the only approximation is the EUP
    # approx-reciprocal in the softmax denominator, so 5e-3 still catches any
    # structural / packing / masking regression.
    err = float(jnp.max(jnp.abs(out - ref)))
    assert err < 5e-3, f"mismatch vs reference: max abs err = {err}"

    print("KERNEL_OK")
</pallas_src>

<mosaic_0001>
module attributes {stable_mosaic.version = 11 : i64} {
  func.func @transformer_block_kernel(%arg0: i32, %arg1: memref<32x32xf32, #tpu.memory_space<vmem>>, %arg2: memref<32x96xf32, #tpu.memory_space<vmem>>, %arg3: memref<32x32xf32, #tpu.memory_space<vmem>>, %arg4: memref<32x128xf32, #tpu.memory_space<vmem>>, %arg5: memref<128x32xf32, #tpu.memory_space<vmem>>, %arg6: memref<8x128xf32, #tpu.memory_space<vmem>>, %arg7: memref<32x32xf32, #tpu.memory_space<vmem>>, %arg8: memref<32x32xf32, #tpu.memory_space<vmem>>) attributes {dimension_semantics = [#tpu.dimension_semantics<parallel>], iteration_bounds = array<i64: 2>, scalar_prefetch = 0 : i64, scratch_operands = 0 : i64, tpu.core_type = #tpu.core_type<tc>, window_params = [{transform_indices = @transform_0, window_bounds = array<i64: 32, 32>}, {pipeline_mode = #tpu.pipeline_mode<synchronous>, transform_indices = @transform_1, window_bounds = array<i64: 32, 96>}, {pipeline_mode = #tpu.pipeline_mode<synchronous>, transform_indices = @transform_2, window_bounds = array<i64: 32, 32>}, {pipeline_mode = #tpu.pipeline_mode<synchronous>, transform_indices = @transform_3, window_bounds = array<i64: 32, 128>}, {pipeline_mode = #tpu.pipeline_mode<synchronous>, transform_indices = @transform_4, window_bounds = array<i64: 128, 32>}, {pipeline_mode = #tpu.pipeline_mode<synchronous>, transform_indices = @transform_5, window_bounds = array<i64: 8, 128>}, {pipeline_mode = #tpu.pipeline_mode<synchronous>, transform_indices = @transform_6, window_bounds = array<i64: 32, 32>}, {transform_indices = @transform_7, window_bounds = array<i64: 32, 32>}]} {
    %c0 = arith.constant 0 : index
    %c0_0 = arith.constant 0 : index
    %0 = vector.load %arg1[%c0, %c0_0] : memref<32x32xf32, #tpu.memory_space<vmem>>, vector<32x32xf32>
    %c0_1 = arith.constant 0 : index
    %c0_2 = arith.constant 0 : index
    %1 = vector.load %arg6[%c0_1, %c0_2] : memref<8x128xf32, #tpu.memory_space<vmem>>, vector<8x128xf32>
    %2 = vector.extract_strided_slice %1 {offsets = [0, 0], sizes = [1, 96], strides = [1, 1]} : vector<8x128xf32> to vector<1x96xf32>
    %3 = vector.extract_strided_slice %1 {offsets = [1, 0], sizes = [1, 32], strides = [1, 1]} : vector<8x128xf32> to vector<1x32xf32>
    %4 = vector.extract_strided_slice %1 {offsets = [2, 0], sizes = [1, 128], strides = [1, 1]} : vector<8x128xf32> to vector<1x128xf32>
    %5 = vector.extract_strided_slice %1 {offsets = [3, 0], sizes = [1, 32], strides = [1, 1]} : vector<8x128xf32> to vector<1x32xf32>
    %6 = vector.extract_strided_slice %1 {offsets = [4, 0], sizes = [1, 32], strides = [1, 1]} : vector<8x128xf32> to vector<1x32xf32>
    %7 = vector.extract_strided_slice %1 {offsets = [5, 0], sizes = [1, 32], strides = [1, 1]} : vector<8x128xf32> to vector<1x32xf32>
    %8 = vector.extract_strided_slice %1 {offsets = [6, 0], sizes = [1, 32], strides = [1, 1]} : vector<8x128xf32> to vector<1x32xf32>
    %9 = vector.extract_strided_slice %1 {offsets = [7, 0], sizes = [1, 32], strides = [1, 1]} : vector<8x128xf32> to vector<1x32xf32>
    %c0_3 = arith.constant 0 : index
    %c0_4 = arith.constant 0 : index
    %10 = vector.load %arg2[%c0_3, %c0_4] : memref<32x96xf32, #tpu.memory_space<vmem>>, vector<32x96xf32>
    %cst = arith.constant dense<0.000000e+00> : vector<32x96xf32>
    %11 = tpu.matmul %0, %10, %cst {dimension_numbers = #tpu.dot_dimension_numbers<[1], [0], [0], [1], [0, 0, 1, 1], [], []>} : vector<32x32xf32>, vector<32x96xf32>, vector<32x96xf32> -> vector<32x96xf32>
    %12 = vector.broadcast %2 : vector<1x96xf32> to vector<32x96xf32>
    %13 = arith.addf %11, %12 : vector<32x96xf32>
    %14 = vector.extract_strided_slice %13 {offsets = [0, 0], sizes = [32, 32], strides = [1, 1]} : vector<32x96xf32> to vector<32x32xf32>
    %15 = vector.extract_strided_slice %14 {offsets = [0, 0], sizes = [32, 8], strides = [1, 1]} : vector<32x32xf32> to vector<32x8xf32>
    %16 = vector.extract_strided_slice %14 {offsets = [0, 8], sizes = [32, 8], strides = [1, 1]} : vector<32x32xf32> to vector<32x8xf32>
    %17 = vector.extract_strided_slice %14 {offsets = [0, 16], sizes = [32, 8], strides = [1, 1]} : vector<32x32xf32> to vector<32x8xf32>
    %18 = vector.extract_strided_slice %14 {offsets = [0, 24], sizes = [32, 8], strides = [1, 1]} : vector<32x32xf32> to vector<32x8xf32>
    %19 = vector.shape_cast %15 : vector<32x8xf32> to vector<1x32x8xf32>
    %20 = vector.shape_cast %16 : vector<32x8xf32> to vector<1x32x8xf32>
    %21 = vector.shape_cast %17 : vector<32x8xf32> to vector<1x32x8xf32>
    %22 = vector.shape_cast %18 : vector<32x8xf32> to vector<1x32x8xf32>
    %23 = tpu.concatenate %19, %20, %21, %22 in 0 : vector<1x32x8xf32>, vector<1x32x8xf32>, vector<1x32x8xf32>, vector<1x32x8xf32> -> vector<4x32x8xf32>
    %24 = vector.extract_strided_slice %13 {offsets = [0, 32], sizes = [32, 32], strides = [1, 1]} : vector<32x96xf32> to vector<32x32xf32>
    %25 = vector.extract_strided_slice %24 {offsets = [0, 0], sizes = [32, 8], strides = [1, 1]} : vector<32x32xf32> to vector<32x8xf32>
    %26 = vector.extract_strided_slice %24 {offsets = [0, 8], sizes = [32, 8], strides = [1, 1]} : vector<32x32xf32> to vector<32x8xf32>
    %27 = vector.extract_strided_slice %24 {offsets = [0, 16], sizes = [32, 8], strides = [1, 1]} : vector<32x32xf32> to vector<32x8xf32>
    %28 = vector.extract_strided_slice %24 {offsets = [0, 24], sizes = [32, 8], strides = [1, 1]} : vector<32x32xf32> to vector<32x8xf32>
    %29 = vector.shape_cast %25 : vector<32x8xf32> to vector<1x32x8xf32>
    %30 = vector.shape_cast %26 : vector<32x8xf32> to vector<1x32x8xf32>
    %31 = vector.shape_cast %27 : vector<32x8xf32> to vector<1x32x8xf32>
    %32 = vector.shape_cast %28 : vector<32x8xf32> to vector<1x32x8xf32>
    %33 = tpu.concatenate %29, %30, %31, %32 in 0 : vector<1x32x8xf32>, vector<1x32x8xf32>, vector<1x32x8xf32>, vector<1x32x8xf32> -> vector<4x32x8xf32>
    %34 = vector.extract_strided_slice %13 {offsets = [0, 64], sizes = [32, 32], strides = [1, 1]} : vector<32x96xf32> to vector<32x32xf32>
    %35 = vector.extract_strided_slice %34 {offsets = [0, 0], sizes = [32, 8], strides = [1, 1]} : vector<32x32xf32> to vector<32x8xf32>
    %36 = vector.extract_strided_slice %34 {offsets = [0, 8], sizes = [32, 8], strides = [1, 1]} : vector<32x32xf32> to vector<32x8xf32>
    %37 = vector.extract_strided_slice %34 {offsets = [0, 16], sizes = [32, 8], strides = [1, 1]} : vector<32x32xf32> to vector<32x8xf32>
    %38 = vector.extract_strided_slice %34 {offsets = [0, 24], sizes = [32, 8], strides = [1, 1]} : vector<32x32xf32> to vector<32x8xf32>
    %39 = vector.shape_cast %35 : vector<32x8xf32> to vector<1x32x8xf32>
    %40 = vector.shape_cast %36 : vector<32x8xf32> to vector<1x32x8xf32>
    %41 = vector.shape_cast %37 : vector<32x8xf32> to vector<1x32x8xf32>
    %42 = vector.shape_cast %38 : vector<32x8xf32> to vector<1x32x8xf32>
    %43 = tpu.concatenate %39, %40, %41, %42 in 0 : vector<1x32x8xf32>, vector<1x32x8xf32>, vector<1x32x8xf32>, vector<1x32x8xf32> -> vector<4x32x8xf32>
    "tpu.trace_start"() <{level = 10 : i32, message = "hmd,hnd->hmn"}> : () -> ()
    %cst_5 = arith.constant dense<0.000000e+00> : vector<4x32x32xf32>
    %44 = tpu.matmul %23, %33, %cst_5 {dimension_numbers = #tpu.dot_dimension_numbers<[2], [2], [1], [1], [0, 0, 0, 1, 1, 1], [0], [0]>} : vector<4x32x8xf32>, vector<4x32x8xf32>, vector<4x32x32xf32> -> vector<4x32x32xf32>
    "tpu.trace_stop"() : () -> ()
    %c0_6 = arith.constant 0 : index
    %c0_7 = arith.constant 0 : index
    %45 = vector.load %arg7[%c0_6, %c0_7] : memref<32x32xf32, #tpu.memory_space<vmem>>, vector<32x32xf32>
    %46 = vector.shape_cast %45 : vector<32x32xf32> to vector<1x32x32xf32>
    %47 = vector.broadcast %46 : vector<1x32x32xf32> to vector<4x32x32xf32>
    %48 = arith.addf %44, %47 : vector<4x32x32xf32>
    %cst_8 = arith.constant dense<0xFF800000> : vector<4x32xf32>
    %49 = vector.multi_reduction <maximumf>, %48, %cst_8 [2] : vector<4x32x32xf32> to vector<4x32xf32>
    %50 = vector.shape_cast %49 : vector<4x32xf32> to vector<4x32x1xf32>
    %51 = vector.broadcast %50 : vector<4x32x1xf32> to vector<4x32x32xf32>
    %52 = arith.subf %48, %51 : vector<4x32x32xf32>
    %53 = math.exp %52 : vector<4x32x32xf32>
    %cst_9 = arith.constant dense<0.000000e+00> : vector<4x32xf32>
    %54 = vector.multi_reduction <add>, %53, %cst_9 [2] : vector<4x32x32xf32> to vector<4x32xf32>
    %55 = vector.shape_cast %54 : vector<4x32xf32> to vector<4x32x1xf32>
    %56 = tpu.reciprocal %55 {approx = true} : vector<4x32x1xf32> -> vector<4x32x1xf32>
    %57 = vector.broadcast %56 : vector<4x32x1xf32> to vector<4x32x32xf32>
    %58 = arith.mulf %53, %57 : vector<4x32x32xf32>
    "tpu.trace_start"() <{level = 10 : i32, message = "hmn,hnd->hmd"}> : () -> ()
    %cst_10 = arith.constant dense<0.000000e+00> : vector<4x32x8xf32>
    %59 = tpu.matmul %58, %43, %cst_10 {dimension_numbers = #tpu.dot_dimension_numbers<[2], [1], [1], [2], [0, 0, 0, 1, 1, 2], [0], [0]>} : vector<4x32x32xf32>, vector<4x32x8xf32>, vector<4x32x8xf32> -> vector<4x32x8xf32>
    "tpu.trace_stop"() : () -> ()
    %60 = vector.extract_strided_slice %59 {offsets = [0, 0, 0], sizes = [1, 32, 8], strides = [1, 1, 1]} : vector<4x32x8xf32> to vector<1x32x8xf32>
    %61 = vector.shape_cast %60 : vector<1x32x8xf32> to vector<32x8xf32>
    %62 = vector.extract_strided_slice %59 {offsets = [1, 0, 0], sizes = [1, 32, 8], strides = [1, 1, 1]} : vector<4x32x8xf32> to vector<1x32x8xf32>
    %63 = vector.shape_cast %62 : vector<1x32x8xf32> to vector<32x8xf32>
    %64 = vector.extract_strided_slice %59 {offsets = [2, 0, 0], sizes = [1, 32, 8], strides = [1, 1, 1]} : vector<4x32x8xf32> to vector<1x32x8xf32>
    %65 = vector.shape_cast %64 : vector<1x32x8xf32> to vector<32x8xf32>
    %66 = vector.extract_strided_slice %59 {offsets = [3, 0, 0], sizes = [1, 32, 8], strides = [1, 1, 1]} : vector<4x32x8xf32> to vector<1x32x8xf32>
    %67 = vector.shape_cast %66 : vector<1x32x8xf32> to vector<32x8xf32>
    %68 = tpu.concatenate %61, %63, %65, %67 in 1 : vector<32x8xf32>, vector<32x8xf32>, vector<32x8xf32>, vector<32x8xf32> -> vector<32x32xf32>
    %c0_11 = arith.constant 0 : index
    %c0_12 = arith.constant 0 : index
    %69 = vector.load %arg3[%c0_11, %c0_12] : memref<32x32xf32, #tpu.memory_space<vmem>>, vector<32x32xf32>
    %cst_13 = arith.constant dense<0.000000e+00> : vector<32x32xf32>
    %70 = tpu.matmul %68, %69, %cst_13 {dimension_numbers = #tpu.dot_dimension_numbers<[1], [0], [0], [1], [0, 0, 1, 1], [], []>} : vector<32x32xf32>, vector<32x32xf32>, vector<32x32xf32> -> vector<32x32xf32>
    %71 = vector.broadcast %3 : vector<1x32xf32> to vector<32x32xf32>
    %72 = arith.addf %70, %71 : vector<32x32xf32>
    %73 = arith.addf %0, %72 : vector<32x32xf32>
    %cst_14 = arith.constant dense<0.000000e+00> : vector<32xf32>
    %74 = vector.multi_reduction <add>, %73, %cst_14 [1] : vector<32x32xf32> to vector<32xf32>
    %75 = vector.shape_cast %74 : vector<32xf32> to vector<32x1xf32>
    %cst_15 = arith.constant 3.200000e+01 : f32
    %76 = vector.broadcast %cst_15 : f32 to vector<32x1xf32>
    %77 = arith.divf %75, %76 : vector<32x1xf32>
    %78 = vector.broadcast %77 : vector<32x1xf32> to vector<32x32xf32>
    %79 = arith.subf %73, %78 : vector<32x32xf32>
    %80 = arith.mulf %79, %79 : vector<32x32xf32>
    %cst_16 = arith.constant dense<0.000000e+00> : vector<32xf32>
    %81 = vector.multi_reduction <add>, %80, %cst_16 [1] : vector<32x32xf32> to vector<32xf32>
    %82 = vector.shape_cast %81 : vector<32xf32> to vector<32x1xf32>
    %cst_17 = arith.constant 3.200000e+01 : f32
    %83 = vector.broadcast %cst_17 : f32 to vector<32x1xf32>
    %84 = arith.divf %82, %83 : vector<32x1xf32>
    %85 = vector.broadcast %77 : vector<32x1xf32> to vector<32x32xf32>
    %86 = arith.subf %73, %85 : vector<32x32xf32>
    %cst_18 = arith.constant 9.99999974E-6 : f32
    %87 = vector.broadcast %cst_18 : f32 to vector<32x1xf32>
    %88 = arith.addf %84, %87 : vector<32x1xf32>
    %89 = math.rsqrt %88 : vector<32x1xf32>
    %90 = vector.broadcast %89 : vector<32x1xf32> to vector<32x32xf32>
    %91 = arith.mulf %86, %90 : vector<32x32xf32>
    %92 = vector.broadcast %6 : vector<1x32xf32> to vector<32x32xf32>
    %93 = arith.mulf %91, %92 : vector<32x32xf32>
    %94 = vector.broadcast %7 : vector<1x32xf32> to vector<32x32xf32>
    %95 = arith.addf %93, %94 : vector<32x32xf32>
    %c0_19 = arith.constant 0 : index
    %c0_20 = arith.constant 0 : index
    %96 = vector.load %arg4[%c0_19, %c0_20] : memref<32x128xf32, #tpu.memory_space<vmem>>, vector<32x128xf32>
    %cst_21 = arith.constant dense<0.000000e+00> : vector<32x128xf32>
    %97 = tpu.matmul %95, %96, %cst_21 {dimension_numbers = #tpu.dot_dimension_numbers<[1], [0], [0], [1], [0, 0, 1, 1], [], []>} : vector<32x32xf32>, vector<32x128xf32>, vector<32x128xf32> -> vector<32x128xf32>
    %98 = vector.broadcast %4 : vector<1x128xf32> to vector<32x128xf32>
    %99 = arith.addf %97, %98 : vector<32x128xf32>
    %cst_22 = arith.constant 5.000000e-01 : f32
    %100 = vector.broadcast %cst_22 : f32 to vector<32x128xf32>
    %101 = arith.mulf %100, %99 : vector<32x128xf32>
    %cst_23 = arith.constant 0.707106769 : f32
    %102 = vector.broadcast %cst_23 : f32 to vector<32x128xf32>
    %103 = arith.mulf %99, %102 : vector<32x128xf32>
    %104 = math.erf %103 : vector<32x128xf32>
    %cst_24 = arith.constant 1.000000e+00 : f32
    %105 = vector.broadcast %cst_24 : f32 to vector<32x128xf32>
    %106 = arith.addf %105, %104 : vector<32x128xf32>
    %107 = arith.mulf %101, %106 : vector<32x128xf32>
    %c0_25 = arith.constant 0 : index
    %c0_26 = arith.constant 0 : index
    %108 = vector.load %arg5[%c0_25, %c0_26] : memref<128x32xf32, #tpu.memory_space<vmem>>, vector<128x32xf32>
    %cst_27 = arith.constant dense<0.000000e+00> : vector<32x32xf32>
    %109 = tpu.matmul %107, %108, %cst_27 {dimension_numbers = #tpu.dot_dimension_numbers<[1], [0], [0], [1], [0, 0, 1, 1], [], []>} : vector<32x128xf32>, vector<128x32xf32>, vector<32x32xf32> -> vector<32x32xf32>
    %110 = vector.broadcast %5 : vector<1x32xf32> to vector<32x32xf32>
    %111 = arith.addf %109, %110 : vector<32x32xf32>
    %112 = arith.addf %95, %111 : vector<32x32xf32>
    %cst_28 = arith.constant dense<0.000000e+00> : vector<32xf32>
    %113 = vector.multi_reduction <add>, %112, %cst_28 [1] : vector<32x32xf32> to vector<32xf32>
    %114 = vector.shape_cast %113 : vector<32xf32> to vector<32x1xf32>
    %cst_29 = arith.constant 3.200000e+01 : f32
    %115 = vector.broadcast %cst_29 : f32 to vector<32x1xf32>
    %116 = arith.divf %114, %115 : vector<32x1xf32>
    %117 = vector.broadcast %116 : vector<32x1xf32> to vector<32x32xf32>
    %118 = arith.subf %112, %117 : vector<32x32xf32>
    %119 = arith.mulf %118, %118 : vector<32x32xf32>
    %cst_30 = arith.constant dense<0.000000e+00> : vector<32xf32>
    %120 = vector.multi_reduction <add>, %119, %cst_30 [1] : vector<32x32xf32> to vector<32xf32>
    %121 = vector.shape_cast %120 : vector<32xf32> to vector<32x1xf32>
    %cst_31 = arith.constant 3.200000e+01 : f32
    %122 = vector.broadcast %cst_31 : f32 to vector<32x1xf32>
    %123 = arith.divf %121, %122 : vector<32x1xf32>
    %124 = vector.broadcast %116 : vector<32x1xf32> to vector<32x32xf32>
    %125 = arith.subf %112, %124 : vector<32x32xf32>
    %cst_32 = arith.constant 9.99999974E-6 : f32
    %126 = vector.broadcast %cst_32 : f32 to vector<32x1xf32>
    %127 = arith.addf %123, %126 : vector<32x1xf32>
    %128 = math.rsqrt %127 : vector<32x1xf32>
    %129 = vector.broadcast %128 : vector<32x1xf32> to vector<32x32xf32>
    %130 = arith.mulf %125, %129 : vector<32x32xf32>
    %131 = vector.broadcast %8 : vector<1x32xf32> to vector<32x32xf32>
    %132 = arith.mulf %130, %131 : vector<32x32xf32>
    %133 = vector.broadcast %9 : vector<1x32xf32> to vector<32x32xf32>
    %134 = arith.addf %132, %133 : vector<32x32xf32>
    %c0_33 = arith.constant 0 : index
    %c0_34 = arith.constant 0 : index
    %135 = vector.load %arg8[%c0_33, %c0_34] : memref<32x32xf32, #tpu.memory_space<vmem>>, vector<32x32xf32>
    tpu.vector_store %arg8[%c0_33, %c0_34], %134 {strides = array<i32>} : memref<32x32xf32, #tpu.memory_space<vmem>>, vector<32x32xf32>,
    return
  }
  func.func @transform_0(%arg0: i32) -> (i32, i32) {
    %c0_i32 = arith.constant 0 : i32
    %c0_i32_0 = arith.constant 0 : i32
    return %arg0, %c0_i32 : i32, i32
  }
  func.func @transform_1(%arg0: i32) -> (i32, i32) {
    %c0_i32 = arith.constant 0 : i32
    %c0_i32_0 = arith.constant 0 : i32
    %c0_i32_1 = arith.constant 0 : i32
    return %c0_i32, %c0_i32_0 : i32, i32
  }
  func.func @transform_2(%arg0: i32) -> (i32, i32) {
    %c0_i32 = arith.constant 0 : i32
    %c0_i32_0 = arith.constant 0 : i32
    %c0_i32_1 = arith.constant 0 : i32
    return %c0_i32, %c0_i32_0 : i32, i32
  }
  func.func @transform_3(%arg0: i32) -> (i32, i32) {
    %c0_i32 = arith.constant 0 : i32
    %c0_i32_0 = arith.constant 0 : i32
    %c0_i32_1 = arith.constant 0 : i32
    return %c0_i32, %c0_i32_0 : i32, i32
  }
  func.func @transform_4(%arg0: i32) -> (i32, i32) {
    %c0_i32 = arith.constant 0 : i32
    %c0_i32_0 = arith.constant 0 : i32
    %c0_i32_1 = arith.constant 0 : i32
    return %c0_i32, %c0_i32_0 : i32, i32
  }
  func.func @transform_5(%arg0: i32) -> (i32, i32) {
    %c0_i32 = arith.constant 0 : i32
    %c0_i32_0 = arith.constant 0 : i32
    %c0_i32_1 = arith.constant 0 : i32
    return %c0_i32, %c0_i32_0 : i32, i32
  }
  func.func @transform_6(%arg0: i32) -> (i32, i32) {
    %c0_i32 = arith.constant 0 : i32
    %c0_i32_0 = arith.constant 0 : i32
    %c0_i32_1 = arith.constant 0 : i32
    return %c0_i32, %c0_i32_0 : i32, i32
  }
  func.func @transform_7(%arg0: i32) -> (i32, i32) {
    %c0_i32 = arith.constant 0 : i32
    %c0_i32_0 = arith.constant 0 : i32
    return %arg0, %c0_i32 : i32, i32
  }
}

</mosaic_0001>

<bundles_post_ra>
// kernel: tpu_custom_call.1
= control target key start
LH: loop header
LB: loop body
LE: loop exit
PB: predicated region body
PF: predicated region fallthrough
CT: control target
= control target key end

     0   :  { %s2612_s24 = smov 0   ;;  %s3193_s0 = inlined_call_operand.vmem [shape: f32[64,32], index: 0, kind: input, shape index: {}]   ;;  %s3194_s1 = inlined_call_operand.vmem [shape: f32[32,96], index: 1, kind: input, shape index: {}]   ;;  %s3195_s2 = inlined_call_operand.vmem [shape: f32[32,32], index: 2, kind: input, shape index: {}]   ;;  %s3196_s3 = inlined_call_operand.vmem [shape: f32[32,128], index: 3, kind: input, shape index: {}]   ;;  %s3197_s4 = inlined_call_operand.vmem [shape: f32[128,32], index: 4, kind: input, shape index: {}]   ;;  %s3198_s5 = inlined_call_operand.vmem [shape: f32[8,128], index: 5, kind: input, shape index: {}]   ;;  %s3199_s6 = inlined_call_operand.vmem [shape: f32[32,32], index: 6, kind: input, shape index: {}]   ;;  %s3200_s7 = inlined_call_operand.vmem [shape: f32[64,32], index: 7, kind: output, shape index: {}]  }
   0x1 LB: > { %s2076_s25 = sadd.s32 4294967295, %s2562_s24   ;;  %p2080_p0 = scmp.ge.s32.totalorder %s2562_s24, 1  ;;  %s2562_s24 = sphi %s2612_s24, %s17_s24  }
   0x2   : > { %p238_p1 = scmp.lt.s32.totalorder %s2562_s24, 3 }
   0x4   : > { %p239_p2 = pnand %p2080_p0, %p238_p1 }
   0x5   : > { %s2081_s30 = sshll.u32 (!%p239_p2), %s2076_s25, 2  ;;  %s2564_s18 = smov (!%p239_p2), 120  }
   0x6   : > { %242 = sbr.rel (%p239_p2) target bundleno = 2556 (0x9fc), region = 48  ;;  %p271_p3 = scmp.lt.s32.totalorder (!%p239_p2), %s2081_s30, 7 }
   0x7   : > { %s2565_s19 = smov (!%p239_p2), 104   ;;  %s2566_s20 = smov (!%p239_p2), 112  }
   0x8   : > { %s2567_s21 = smov (!%p239_p2), 96   ;;  %s2568_s22 = smov (!%p239_p2), 64  }
   0x9   : > { %s2569_s10 = smov (!%p239_p2), 8  }
   0xb   : > { %v290_v0 = vld [vmem:[%s3194_s1 + $0x18] sm:$0xff]  ;;  %v289_v1 = vld [vmem:[%s3194_s1 + $0x10] sm:$0xff]  ;;  %v288_v2 = vld [vmem:[%s3194_s1 + $0x8] sm:$0xff]  ;;  %s3202_s30 = smov (!%p271_p3, %s2081_s30), 7  ;;  %vm295_vm0 = vcmask 261120   ;;  %v291_v8 = vlaneseq  ;;  %vm433_vm1 = vcmask 64512  }
   0xc   : > { %2255 = vmatprep.subr.mxu0 %v290_v0  ;;  %v287_v3 = vld [vmem:[%s3194_s1] sm:$0xff]  ;;  %s2082_s12 = sshll.u32 %s3202_s30, 3  ;;  %v422_v59 = vld [vmem:[%s3199_s6 + $0x8] sm:$0xff]  ;;  %vm1526_vm2 = vcmask 130048   ;;  %vm1531_vm3 = vcmask 195584  }
   0xd   : > { %2256 = vmatpush3.msra.mxu0 %v290_v0  ;;  %s2640_s15 = scalar_lea.vmem %s3193_s0, %s2082_s12  ;;  %v2650_v9 = vshrl.u32 %v291_v8, 7  ;;  %v286_v11 = vld [vmem:[%s3198_s5] sm:$0xff]  ;;  %v424_v0 = vld [vmem:[%s3199_s6 + $0x18] sm:$0xff]  ;;  %s280_s27 = scalar_lea.vmem %s3200_s7, %s2082_s12 }
   0xe   : > { %2257 = vmatprep.subr.mxu0 %v289_v1  ;;  %v282_v4 = vld [vmem:[%s2640_s15] sm:$0xff]  ;;  %v283_v5 = vld [vmem:[%s2640_s15 + $0x8] sm:$0xff]  ;;  %v284_v6 = vld [vmem:[%s2640_s15 + $0x10] sm:$0xff] }
   0xf   : > { %2258 = vmatpush3.msra.mxu0 %v289_v1  ;;  %2263 = vmatprep.mubr.msk.f32.mxu0 %vm295_vm0, %v282_v4  ;;  %v285_v7 = vld [vmem:[%s2640_s15 + $0x18] sm:$0xff]  ;;  %v293_v10 = vsub.s32 0, %v2650_v9  ;;  %v421_v61 = vld [vmem:[%s3199_s6] sm:$0xff]  ;;  %v423_v4 = vld [vmem:[%s3199_s6 + $0x10] sm:$0xff] }
  0x10   : > { %2259 = vmatprep.subr.mxu0 %v288_v2 }
  0x11   : > { %2260 = vmatpush3.msra.mxu0 %v288_v2  ;;  %v294_v12 = vrot.slane %v286_v11, %v293_v10 }
  0x12   : > { %2261 = vmatprep.subr.mxu0 %v287_v3 }
  0x13   : > { %2262 = vmatpush3.msra.mxu0 %v287_v3 }
  0x14   : > { %2264 = vmatmul.mubr.msk.f32.vlgmr.msra.gmra.mxu0 %vm295_vm0, %v283_v5 }
  0x15   : > { %2266 = vmatprep.mubr.msk.f32.mxu0 %vm295_vm0, %v284_v6 }
  0x18   : > { %2267 = vmatmul.mubr.msk.f32.gmra.mxu0 %vm295_vm0, %v285_v7 }
  0xd4   : > { %v2265_v13 = vpop.f32.mrf.mxu0 }
  0xd5   : > { %v2656_v14 = vadd.f32 %v2265_v13, %v294_v12 }
  0xd6   : > { %v374_v15 = vpop.f32.mrf.mxu0 }
  0xd7   : > { %v2658_v16 = vadd.f32 %v374_v15, %v294_v12  ;;  %399 = vrot.lane.b32.xlu1 %v2656_v14, %s2564_s18 }
  0xd8   : > { %v2268_v17 = vpop.f32.mrf.mxu0 }
  0xd9   : > { %v2661_v18 = vadd.f32 %v2268_v17, %v294_v12  ;;  %2277 = vmatprep.mubr.msk.f32.mxu0 %vm433_vm1, %v2658_v16 }
  0xda   : > { %v384_v19 = vpop.f32.mrf.mxu0 }
  0xdb   : > { %403 = vrot.lane.b32.xlu0 %v2661_v18, %s2564_s18  ;;  %397 = vrot.lane.b32.xlu1 %v2658_v16, %s2564_s18  ;;  %v2667_v20 = vadd.f32 %v384_v19, %v294_v12 }
  0xdf   : > { %401 = vrot.lane.b32.xlu0 %v2667_v20, %s2564_s18  ;;  %419 = vrot.lane.b32.xlu1 %v2661_v18, %s2565_s19 }
  0xe3   : > { %411 = vrot.lane.b32.xlu0 %v2661_v18, %s2566_s20  ;;  %417 = vrot.lane.b32.xlu1 %v2667_v20, %s2565_s19 }
  0xe7   : > { %409 = vrot.lane.b32.xlu0 %v2667_v20, %s2566_s20  ;;  %415 = vrot.lane.b32.xlu1 %v2656_v14, %s2565_s19 }
  0xeb   : > { %407 = vrot.lane.b32.xlu0 %v2656_v14, %s2566_s20  ;;  %413 = vrot.lane.b32.xlu1 %v2658_v16, %s2565_s19  ;;  %s2570_s19 = smov 16  }
  0xef   : > { %405 = vrot.lane.b32.xlu0 %v2658_v16, %s2566_s20  ;;  %429 = vrot.lane.b32.xlu1 %v2667_v20, %s2567_s21 }
  0xf3   : > { %431 = vrot.lane.b32.xlu0 %v2661_v18, %s2567_s21  ;;  %425 = vrot.lane.b32.xlu1 %v2658_v16, %s2567_s21 }
  0xf7   : > { %427 = vrot.lane.b32.xlu0 %v2656_v14, %s2567_s21 }
 0x149   : > { %v2686_v21 = vpop.permute.xlu1 %399 }
 0x14d   : > { %v2688_v22 = vpop.permute.xlu0 %403  ;;  %v398_v23 = vpop.permute.xlu1 %397 }
 0x14e   : > { %541 = vrot.lane.b32.xlu0 %v2688_v22, %s2567_s21 }
 0x151   : > { %v2692_v24 = vpop.permute.xlu0 %401  ;;  %v2694_v25 = vpop.permute.xlu1 %419 }
 0x152   : > { %537 = vrot.lane.b32.xlu0 %v2686_v21, %s2567_s21  ;;  %539 = vrot.lane.b32.xlu1 %v2692_v24, %s2567_s21 }
 0x155   : > { %v2700_v26 = vpop.permute.xlu0 %411  ;;  %v2702_v27 = vpop.permute.xlu1 %417 }
 0x156   : > { %650 = vrot.lane.b32.xlu0 %v2700_v26, %s2567_s21  ;;  %535 = vrot.lane.b32.xlu1 %v398_v23, %s2567_s21 }
 0x159   : > { %v2707_v28 = vpop.permute.xlu0 %409  ;;  %v2713_v29 = vpop.permute.xlu1 %415 }
 0x15a   : > { %648 = vrot.lane.b32.xlu0 %v2707_v28, %s2567_s21  ;;  %759 = vrot.lane.b32.xlu1 %v2694_v25, %s2567_s21 }
 0x15d   : > { %v2715_v30 = vpop.permute.xlu0 %407  ;;  %v2721_v31 = vpop.permute.xlu1 %413 }
 0x15e   : > { %646 = vrot.lane.b32.xlu0 %v2715_v30, %s2567_s21  ;;  %757 = vrot.lane.b32.xlu1 %v2702_v27, %s2567_s21 }
 0x161   : > { %v2723_v32 = vpop.permute.xlu0 %405  ;;  %v430_v34 = vpop.permute.xlu1 %429 }
 0x162   : > { %2305 = vmatprep.mubr.msk.f32.mxu1 %vm433_vm1, %v2723_v32  ;;  %644 = vrot.lane.b32.xlu0 %v2723_v32, %s2567_s21 }
 0x163   : > { %755 = vrot.lane.b32.xlu1 %v2713_v29, %s2567_s21 }
 0x165   : > { %v432_v33 = vpop.permute.xlu0 %431  ;;  %v426_v36 = vpop.permute.xlu1 %425 }
 0x166   : > { %1153 = vrot.lane.b32.xlu0 %v2688_v22, %s2568_s22  ;;  %2269 = vmatprep.subr.msk.mxu0 %vm433_vm1, %v432_v33 }
 0x167   : > { %753 = vrot.lane.b32.xlu1 %v2721_v31, %s2567_s21  ;;  %2270 = vmatpush3.xpose.msk.msra.mxu0 %vm433_vm1, %v432_v33 }
 0x168   : > { %2271 = vmatprep.subr.msk.mxu0 %vm433_vm1, %v430_v34 }
 0x169   : > { %v428_v35 = vpop.permute.xlu0 %427 }
 0x16a   : > { %1040 = vrot.lane.b32.xlu0 %v2656_v14, %s2568_s22 }
 0x16b   : > { %1044 = vrot.lane.b32.xlu1 %v2661_v18, %s2568_s22  ;;  %2272 = vmatpush3.xpose.msk.msra.mxu0 %vm433_vm1, %v430_v34 }
 0x16c   : > { %2273 = vmatprep.subr.msk.mxu0 %vm433_vm1, %v428_v35 }
 0x16e   : > { %1038 = vrot.lane.b32.xlu0 %v2658_v16, %s2568_s22 }
 0x16f   : > { %1042 = vrot.lane.b32.xlu1 %v2667_v20, %s2568_s22  ;;  %2274 = vmatpush3.xpose.msk.msra.mxu0 %vm433_vm1, %v428_v35 }
 0x170   : > { %2275 = vmatprep.subr.msk.mxu0 %vm433_vm1, %v426_v36 }
 0x172   : > { %1262 = vrot.lane.b32.xlu0 %v2700_v26, %s2568_s22 }
 0x173   : > { %1149 = vrot.lane.b32.xlu1 %v2686_v21, %s2568_s22  ;;  %2276 = vmatpush3.xpose.msk.msra.mxu0 %vm433_vm1, %v426_v36 }
 0x176   : > { %1260 = vrot.lane.b32.xlu0 %v2707_v28, %s2568_s22  ;;  %2278 = vmatmul.mubr.msk.f32.vlgmr.msra.gmra.mxu0 %vm433_vm1, %v2656_v14 }
 0x177   : > { %1147 = vrot.lane.b32.xlu1 %v398_v23, %s2568_s22  ;;  %2280 = vmatprep.mubr.msk.f32.mxu0 %vm433_vm1, %v2667_v20 }
 0x17a   : > { %2281 = vmatmul.mubr.msk.f32.gmra.mxu0 %vm433_vm1, %v2661_v18 }
 0x17b   : > { %1371 = vrot.lane.b32.xlu1 %v2694_v25, %s2568_s22  ;;  %2291 = vmatprep.mubr.msk.f32.mxu0 %vm433_vm1, %v398_v23 }
 0x17f   : > { %1151 = vrot.lane.b32.xlu1 %v2692_v24, %s2568_s22 }
 0x183   : > { %1369 = vrot.lane.b32.xlu1 %v2702_v27, %s2568_s22 }
 0x1c0   : > { %v542_v37 = vpop.permute.xlu0 %541 }
 0x1c1   : > { %2283 = vmatprep.subr.msk.mxu0 %vm433_vm1, %v542_v37 }
 0x1c2   : > { %2284 = vmatpush3.xpose.msk.msra.mxu0 %vm433_vm1, %v542_v37 }
 0x1c4   : > { %v538_v38 = vpop.permute.xlu0 %537  ;;  %v540_v39 = vpop.permute.xlu1 %539 }
 0x1c5   : > { %2285 = vmatprep.subr.msk.mxu0 %vm433_vm1, %v540_v39 }
 0x1c6   : > { %2286 = vmatpush3.xpose.msk.msra.mxu0 %vm433_vm1, %v540_v39 }
 0x1c7   : > { %2287 = vmatprep.subr.msk.mxu0 %vm433_vm1, %v538_v38 }
 0x1c8   : > { %v651_v40 = vpop.permute.xlu0 %650  ;;  %v536_v41 = vpop.permute.xlu1 %535 }
 0x1c9   : > { %2297 = vmatprep.subr.msk.mxu1 %vm433_vm1, %v651_v40 }
 0x1ca   : > { %2288 = vmatpush3.xpose.msk.msra.mxu0 %vm433_vm1, %v538_v38  ;;  %2298 = vmatpush3.xpose.msk.msra.mxu1 %vm433_vm1, %v651_v40 }
 0x1cb   : > { %2289 = vmatprep.subr.msk.mxu0 %vm433_vm1, %v536_v41 }
 0x1cc   : > { %v649_v42 = vpop.permute.xlu0 %648  ;;  %v760_v43 = vpop.permute.xlu1 %759 }
 0x1cd   : > { %2299 = vmatprep.subr.msk.mxu1 %vm433_vm1, %v649_v42 }
 0x1ce   : > { %2290 = vmatpush3.xpose.msk.msra.mxu0 %vm433_vm1, %v536_v41  ;;  %2300 = vmatpush3.xpose.msk.msra.mxu1 %vm433_vm1, %v649_v42 }
 0x1cf   : > { %2311 = vmatprep.subr.msk.mxu0 %vm433_vm1, %v760_v43 }
 0x1d0   : > { %v647_v44 = vpop.permute.xlu0 %646  ;;  %v758_v45 = vpop.permute.xlu1 %757 }
 0x1d1   : > { %2292 = vmatmul.mubr.msk.f32.vlgmr.msra.gmra.mxu0 %vm433_vm1, %v2686_v21  ;;  %2301 = vmatprep.subr.msk.mxu1 %vm433_vm1, %v647_v44 }
 0x1d2   : > { %2294 = vmatprep.mubr.msk.f32.mxu0 %vm433_vm1, %v2692_v24  ;;  %2302 = vmatpush3.xpose.msk.msra.mxu1 %vm433_vm1, %v647_v44 }
 0x1d3   : > { %2312 = vmatpush3.xpose.msk.msra.mxu0 %vm433_vm1, %v760_v43 }
 0x1d4   : > { %2313 = vmatprep.subr.msk.mxu0 %vm433_vm1, %v758_v45  ;;  %v645_v46 = vpop.permute.xlu0 %644 }
 0x1d5   : > { %v756_v47 = vpop.permute.xlu1 %755  ;;  %2295 = vmatmul.mubr.msk.f32.gmra.mxu0 %vm433_vm1, %v2688_v22  ;;  %2303 = vmatprep.subr.msk.mxu1 %vm433_vm1, %v645_v46 }
 0x1d6   : > { %2304 = vmatpush3.xpose.msk.msra.mxu1 %vm433_vm1, %v645_v46  ;;  %2319 = vmatprep.mubr.msk.f32.mxu0 %vm433_vm1, %v2721_v31 }
 0x1d7   : > { %2314 = vmatpush3.xpose.msk.msra.mxu0 %vm433_vm1, %v758_v45 }
 0x1d8   : > { %2315 = vmatprep.subr.msk.mxu0 %vm433_vm1, %v756_v47  ;;  %v1154_v48 = vpop.permute.xlu0 %1153 }
 0x1d9   : > { %v754_v49 = vpop.permute.xlu1 %753  ;;  %2306 = vmatmul.mubr.msk.f32.vlgmr.msra.gmra.mxu1 %vm433_vm1, %v2715_v30 }
 0x1da   : > { %2308 = vmatprep.mubr.msk.f32.mxu1 %vm433_vm1, %v2707_v28 }
 0x1db   : > { %2316 = vmatpush3.xpose.msk.msra.mxu0 %vm433_vm1, %v756_v47 }
 0x1dc   : > { %2317 = vmatprep.subr.msk.mxu0 %vm433_vm1, %v754_v49  ;;  %v1041_v50 = vpop.permute.xlu0 %1040 }
 0x1dd   : > { %v1045_v51 = vpop.permute.xlu1 %1044  ;;  %2309 = vmatmul.mubr.msk.f32.gmra.mxu1 %vm433_vm1, %v2700_v26 }
 0x1de   : > { %2325 = vmatprep.subr.mxu1 %v1045_v51 }
 0x1df   : > { %2318 = vmatpush3.xpose.msk.msra.mxu0 %vm433_vm1, %v754_v49  ;;  %2326 = vmatpush3.msra.mxu1 %v1045_v51 }
 0x1e0   : > { %2339 = vmatprep.subr.mxu0 %v1154_v48  ;;  %v1039_v52 = vpop.permute.xlu0 %1038 }
 0x1e1   : > { %v1043_v53 = vpop.permute.xlu1 %1042 }
 0x1e2   : > { %2320 = vmatmul.mubr.msk.f32.vlgmr.msra.gmra.mxu0 %vm433_vm1, %v2713_v29  ;;  %2327 = vmatprep.subr.mxu1 %v1043_v53 }
 0x1e3   : > { %2322 = vmatprep.mubr.msk.f32.mxu0 %vm433_vm1, %v2702_v27  ;;  %2328 = vmatpush3.msra.mxu1 %v1043_v53 }
 0x1e4   : > { %2340 = vmatpush3.msra.mxu0 %v1154_v48  ;;  %2329 = vmatprep.subr.mxu1 %v1041_v50  ;;  %v2815_v55 = vpop.permute.xlu0 %1262 }
 0x1e5   : > { %2330 = vmatpush3.msra.mxu1 %v1041_v50  ;;  %v1150_v54 = vpop.permute.xlu1 %1149 }
 0x1e6   : > { %2323 = vmatmul.mubr.msk.f32.gmra.mxu0 %vm433_vm1, %v2694_v25  ;;  %2331 = vmatprep.subr.mxu1 %v1039_v52 }
 0x1e7   : > { %2332 = vmatpush3.msra.mxu1 %v1039_v52 }
 0x1e8   : > { %2353 = vmatprep.subr.mxu1 %v2815_v55  ;;  %v2899_v52 = vpop.permute.xlu0 %1260 }
 0x1e9   : > { %v1148_v56 = vpop.permute.xlu1 %1147 }
 0x1ed   : > { %v2818_v57 = vpop.permute.xlu1 %1371 }
 0x1f1   : > { %v1152_v58 = vpop.permute.xlu1 %1151 }
 0x1f2   : > { %2341 = vmatprep.subr.mxu0 %v1152_v58 }
 0x1f3   : > { %2342 = vmatpush3.msra.mxu0 %v1152_v58 }
 0x1f4   : > { %2343 = vmatprep.subr.mxu0 %v1150_v54 }
 0x1f5   : > { %2344 = vmatpush3.msra.mxu0 %v1150_v54  ;;  %v2901_v53 = vpop.permute.xlu1 %1369 }
 0x1f6   : > { %2345 = vmatprep.subr.mxu0 %v1148_v56 }
 0x1f7   : > { %2346 = vmatpush3.msra.mxu0 %v1148_v56 }
 0x1f8   : > { %2367 = vmatprep.subr.mxu0 %v2818_v57 }
 0x236   : > { %v2279_v60 = vpop.f32.mrf.mxu0 }
 0x237   : > { %v2827_v62 = vadd.f32 %v2279_v60, %v422_v59 }
 0x238   : > { %v516_v63 = vpop.f32.mrf.mxu0 }
 0x239   : > { %v2832_v1 = vadd.f32 %v516_v63, %v421_v61  ;;  %v865_v2 = vsel %vm295_vm0, %v2827_v62, -inf }
 0x23a   : > { %866 = vmax.xlane.f32.xlu1 %v865_v2  ;;  %v2282_v3 = vpop.f32.mrf.mxu0 }
 0x23b   : > { %v2839_v5 = vadd.f32 %v2282_v3, %v424_v0  ;;  %v862_v6 = vsel %vm295_vm0, %v2832_v1, -inf }
 0x23c   : > { %v526_v7 = vpop.f32.mrf.mxu0  ;;  %863 = vmax.xlane.f32.xlu0 %v862_v6 }
 0x23d   : > { %v2843_v8 = vadd.f32 %v526_v7, %v423_v4  ;;  %v871_v11 = vsel %vm295_vm0, %v2839_v5, -inf }
 0x23f   : > { %v868_v10 = vsel %vm295_vm0, %v2843_v8, -inf }
 0x240   : > { %869 = vmax.xlane.f32.xlu1 %v868_v10  ;;  %872 = vmax.xlane.f32.xlu0 %v871_v11 }
 0x291   : > { %v2293_v12 = vpop.f32.mrf.mxu0 }
 0x292   : > { %v2849_v13 = vadd.f32 %v2293_v12, %v422_v59 }
 0x293   : > { %v625_v14 = vpop.f32.mrf.mxu0 }
 0x294   : > { %v877_v15 = vsel %vm295_vm0, %v2849_v13, -inf  ;;  %v2855_v21 = vadd.f32 %v625_v14, %v421_v61 }
 0x295   : > { %878 = vmax.xlane.f32.xlu0 %v877_v15  ;;  %v2296_v16 = vpop.f32.mrf.mxu0 }
 0x296   : > { %v2865_v28 = vadd.f32 %v2296_v16, %v424_v0  ;;  %v874_v33 = vsel %vm295_vm0, %v2855_v21, -inf }
 0x297   : > { %v635_v19 = vpop.f32.mrf.mxu0 }
 0x298   : > { %v2861_v25 = vadd.f32 %v635_v19, %v423_v4  ;;  %v883_v39 = vsel %vm295_vm0, %v2865_v28, -inf }
 0x299   : > { %v2307_v17 = vpop.f32.mrf.mxu1 }
 0x29a   : > { %v2853_v18 = vadd.f32 %v2307_v17, %v422_v59  ;;  %v880_v36 = vsel %vm295_vm0, %v2861_v25, -inf }
 0x29b   : > { %v734_v20 = vpop.f32.mrf.mxu1 }
 0x29c   : > { %v2857_v22 = vadd.f32 %v734_v20, %v421_v61  ;;  %v889_v23 = vsel %vm295_vm0, %v2853_v18, -inf }
 0x29d   : > { %v2310_v24 = vpop.f32.mrf.mxu1  ;;  %890 = vmax.xlane.f32.xlu0 %v889_v23 }
 0x29e   : > { %v886_v26 = vsel %vm295_vm0, %v2857_v22, -inf  ;;  %v2873_v37 = vadd.f32 %v2310_v24, %v424_v0 }
 0x29f   : > { %v744_v27 = vpop.f32.mrf.mxu1  ;;  %887 = vmax.xlane.f32.xlu1 %v886_v26 }
 0x2a0   : > { %v2869_v34 = vadd.f32 %v744_v27, %v423_v4  ;;  %v895_v45 = vsel %vm295_vm0, %v2873_v37, -inf }
 0x2a1   : > { %875 = vmax.xlane.f32.xlu0 %v874_v33 }
 0x2a2   : > { %v2321_v35 = vpop.f32.mrf.mxu0  ;;  %v892_v42 = vsel %vm295_vm0, %v2869_v34, -inf }
 0x2a3   : > { %881 = vmax.xlane.f32.xlu1 %v880_v36  ;;  %v2881_v43 = vadd.f32 %v2321_v35, %v422_v59 }
 0x2a4   : > { %v843_v38 = vpop.f32.mrf.mxu0 }
 0x2a5   : > { %884 = vmax.xlane.f32.xlu0 %v883_v39  ;;  %v2877_v40 = vadd.f32 %v843_v38, %v421_v61  ;;  %v901_v49 = vsel %vm295_vm0, %v2881_v43, -inf }
 0x2a6   : > { %v2324_v41 = vpop.f32.mrf.mxu0 }
 0x2a7   : > { %893 = vmax.xlane.f32.xlu1 %v892_v42  ;;  %v898_v47 = vsel %vm295_vm0, %v2877_v40, -inf  ;;  %v2889_v48 = vadd.f32 %v2324_v41, %v424_v0 }
 0x2a8   : > { %v853_v44 = vpop.f32.mrf.mxu0 }
 0x2a9   : > { %896 = vmax.xlane.f32.xlu0 %v895_v45  ;;  %v2885_v46 = vadd.f32 %v853_v44, %v423_v4  ;;  %v907_v51 = vsel %vm295_vm0, %v2889_v48, -inf }
 0x2ab   : > { %899 = vmax.xlane.f32.xlu1 %v898_v47  ;;  %v904_v50 = vsel %vm295_vm0, %v2885_v46, -inf }
 0x2ad   : > { %902 = vmax.xlane.f32.xlu0 %v901_v49 }
 0x2af   : > { %905 = vmax.xlane.f32.xlu1 %v904_v50 }
 0x2b1   : > { %908 = vmax.xlane.f32.xlu0 %v907_v51 }
 0x2c0   : > { %1367 = vrot.lane.b32.xlu1 %v2713_v29, %s2568_s22 }
 0x2c3   : > { %v867_v54 = vpop.xlane.xlu1 %866 }
 0x2c4   : > { %v911_v60 = vsub.f32 %v2827_v62, %v867_v54 }
 0x2c5   : > { %v864_v56 = vpop.xlane.xlu0 %863 }
 0x2c6   : > { %v910_v58 = vsub.f32 %v2832_v1, %v864_v56  ;;  %v928_v2 = vmul.f32 1.442695, %v911_v60 }
 0x2c7   : > { %1258 = vrot.lane.b32.xlu0 %v2715_v30, %s2568_s22 }
 0x2c8   : > { %v926_v63 = vmul.f32 1.442695, %v910_v58 }
 0x2c9   : > { %v870_v59 = vpop.xlane.xlu1 %869  ;;  %v873_v61 = vpop.xlane.xlu0 %872 }
 0x2ca   : > { %v912_v0 = vsub.f32 %v2843_v8, %v870_v59  ;;  %v913_v29 = vsub.f32 %v2839_v5, %v873_v61  ;;  %2463 = vpow2.f32 %v926_v63 }
 0x2cb   : > { %2465 = vpow2.f32 %v928_v2 }
 0x2cc   : > { %v930_v3 = vmul.f32 1.442695, %v912_v0  ;;  %v932_v4 = vmul.f32 1.442695, %v913_v29 }
 0x2ce   : > { %2467 = vpow2.f32 %v930_v3 }
 0x2cf   : > { %2469 = vpow2.f32 %v932_v4 }
 0x2d7   : > { %v2909_v30 = vpop.eup %2463 }
 0x2d8   : > { %v2911_v6 = vpop.eup %2465  ;;  %v958_v62 = vsel %vm295_vm0, %v2909_v30, 0.0 }
 0x2d9   : > { %v961_v7 = vsel %vm295_vm0, %v2911_v6, 0.0 }
 0x2db   : > { %v2915_v1 = vpop.eup %2467 }
 0x2dc   : > { %v2919_v5 = vpop.eup %2469  ;;  %v964_v8 = vsel %vm295_vm0, %v2915_v1, 0.0 }
 0x2dd   : > { %v967_v10 = vsel %vm295_vm0, %v2919_v5, 0.0 }
 0x2e4   : > { %959 = vadd.xlane.f32.xlu1 %v958_v62 }
 0x2e6   : > { %962 = vadd.xlane.f32.xlu0 %v961_v7 }
 0x2e8   : > { %965 = vadd.xlane.f32.xlu1 %v964_v8 }
 0x2ea   : > { %968 = vadd.xlane.f32.xlu0 %v967_v10 }
 0x31e   : > { %v879_v11 = vpop.xlane.xlu0 %878 }
 0x31f   : > { %v915_v12 = vsub.f32 %v2849_v13, %v879_v11 }
 0x321   : > { %v936_v14 = vmul.f32 1.442695, %v915_v12 }
 0x323   : > { %2471 = vpow2.f32 %v936_v14 }
 0x326   : > { %v891_v15 = vpop.xlane.xlu0 %890 }
 0x327   : > { %v919_v16 = vsub.f32 %v2853_v18, %v891_v15 }
 0x328   : > { %v888_v17 = vpop.xlane.xlu1 %887 }
 0x329   : > { %v944_v19 = vmul.f32 1.442695, %v919_v16  ;;  %v918_v20 = vsub.f32 %v2857_v22, %v888_v17 }
 0x32a   : > { %v876_v23 = vpop.xlane.xlu0 %875 }
 0x32b   : > { %2473 = vpow2.f32 %v944_v19  ;;  %v914_v24 = vsub.f32 %v2855_v21, %v876_v23  ;;  %v942_v26 = vmul.f32 1.442695, %v918_v20 }
 0x32c   : > { %v882_v27 = vpop.xlane.xlu1 %881 }
 0x32d   : > { %v934_v33 = vmul.f32 1.442695, %v914_v24  ;;  %v916_v35 = vsub.f32 %v2861_v25, %v882_v27 }
 0x32e   : > { %v885_v36 = vpop.xlane.xlu0 %884 }
 0x32f   : > { %2475 = vpow2.f32 %v934_v33  ;;  %v917_v13 = vsub.f32 %v2865_v28, %v885_v36  ;;  %v938_v39 = vmul.f32 1.442695, %v916_v35 }
 0x330   : > { %v2931_v38 = vpop.eup %2471  ;;  %2477 = vpow2.f32 %v942_v26  ;;  %v894_v18 = vpop.xlane.xlu1 %893 }
 0x331   : > { %v940_v41 = vmul.f32 1.442695, %v917_v13  ;;  %v920_v22 = vsub.f32 %v2869_v34, %v894_v18  ;;  %v973_v21 = vsel %vm295_vm0, %v2931_v38, 0.0 }
 0x332   : > { %974 = vadd.xlane.f32.xlu0 %v973_v21  ;;  %v897_v42 = vpop.xlane.xlu0 %896 }
 0x333   : > { %2479 = vpow2.f32 %v940_v41  ;;  %v921_v25 = vsub.f32 %v2873_v37, %v897_v42  ;;  %v946_v44 = vmul.f32 1.442695, %v920_v22 }
 0x334   : > { %v900_v45 = vpop.xlane.xlu1 %899  ;;  %2481 = vpow2.f32 %v938_v39 }
 0x335   : > { %v948_v28 = vmul.f32 1.442695, %v921_v25  ;;  %v922_v47 = vsub.f32 %v2877_v40, %v900_v45 }
 0x336   : > { %v903_v49 = vpop.xlane.xlu0 %902 }
 0x337   : > { %2483 = vpow2.f32 %v948_v28  ;;  %v923_v50 = vsub.f32 %v2881_v43, %v903_v49  ;;  %v950_v54 = vmul.f32 1.442695, %v922_v47 }
 0x338   : > { %v2939_v51 = vpop.eup %2473  ;;  %2485 = vpow2.f32 %v946_v44  ;;  %v906_v34 = vpop.xlane.xlu1 %905 }
 0x339   : > { %v952_v56 = vmul.f32 1.442695, %v923_v50  ;;  %v924_v58 = vsub.f32 %v2885_v46, %v906_v34  ;;  %v985_v37 = vsel %vm295_vm0, %v2939_v51, 0.0 }
 0x33a   : > { %986 = vadd.xlane.f32.xlu0 %v985_v37  ;;  %v909_v59 = vpop.xlane.xlu0 %908 }
 0x33b   : > { %2487 = vpow2.f32 %v952_v56  ;;  %v925_v40 = vsub.f32 %v2889_v48, %v909_v59  ;;  %v954_v43 = vmul.f32 1.442695, %v924_v58 }
 0x33c   : > { %v2945_v60 = vpop.eup %2475  ;;  %2489 = vpow2.f32 %v950_v54  ;;  %v2989_v20 = vpop.permute.xlu1 %1367 }
 0x33d   : > { %v2947_v61 = vpop.eup %2477  ;;  %v956_v63 = vmul.f32 1.442695, %v925_v40  ;;  %v970_v0 = vsel %vm295_vm0, %v2945_v60, 0.0 }
 0x33e   : > { %971 = vadd.xlane.f32.xlu1 %v970_v0  ;;  %v982_v2 = vsel %vm295_vm0, %v2947_v61, 0.0  ;;  %v1259_v23 = vpop.permute.xlu0 %1258 }
 0x33f   : > { %2491 = vpow2.f32 %v956_v63 }
 0x340   : > { %v2951_v46 = vpop.eup %2479  ;;  %2493 = vpow2.f32 %v954_v43 }
 0x341   : > { %v979_v48 = vsel %vm295_vm0, %v2951_v46, 0.0  ;;  %v2957_v29 = vpop.eup %2481 }
 0x342   : > { %983 = vadd.xlane.f32.xlu1 %v982_v2  ;;  %980 = vadd.xlane.f32.xlu0 %v979_v48  ;;  %v976_v62 = vsel %vm295_vm0, %v2957_v29, 0.0 }
 0x344   : > { %v2959_v3 = vpop.eup %2483 }
 0x345   : > { %v2961_v4 = vpop.eup %2485  ;;  %v991_v7 = vsel %vm295_vm0, %v2959_v3, 0.0 }
 0x346   : > { %977 = vadd.xlane.f32.xlu1 %v976_v62  ;;  %992 = vadd.xlane.f32.xlu0 %v991_v7  ;;  %v988_v10 = vsel %vm295_vm0, %v2961_v4, 0.0 }
 0x348   : > { %v2967_v8 = vpop.eup %2487 }
 0x349   : > { %v997_v11 = vsel %vm295_vm0, %v2967_v8, 0.0  ;;  %v2973_v12 = vpop.eup %2489 }
 0x34a   : > { %989 = vadd.xlane.f32.xlu1 %v988_v10  ;;  %998 = vadd.xlane.f32.xlu0 %v997_v11  ;;  %v994_v15 = vsel %vm295_vm0, %v2973_v12, 0.0 }
 0x34c   : > { %v2975_v14 = vpop.eup %2491 }
 0x34d   : > { %v1003_v16 = vsel %vm295_vm0, %v2975_v14, 0.0  ;;  %v2981_v17 = vpop.eup %2493 }
 0x34e   : > { %995 = vadd.xlane.f32.xlu1 %v994_v15  ;;  %1004 = vadd.xlane.f32.xlu0 %v1003_v16  ;;  %v1000_v19 = vsel %vm295_vm0, %v2981_v17, 0.0 }
 0x352   : > { %1001 = vadd.xlane.f32.xlu1 %v1000_v19 }
 0x363   : > { %1365 = vrot.lane.b32.xlu1 %v2721_v31, %s2568_s22 }
 0x364   : > { %1256 = vrot.lane.b32.xlu0 %v2723_v32, %s2568_s22  ;;  %s2571_s22 = smov 24  }
 0x36d   : > { %v960_v24 = vpop.xlane.xlu1 %959 }
 0x36e   : > { %2495 = vrcp.f32 %v960_v24 }
 0x36f   : > { %v963_v26 = vpop.xlane.xlu0 %962 }
 0x370   : > { %2497 = vrcp.f32 %v963_v26 }
 0x371   : > { %v966_v27 = vpop.xlane.xlu1 %965 }
 0x372   : > { %2499 = vrcp.f32 %v966_v27 }
 0x373   : > { %v969_v33 = vpop.xlane.xlu0 %968 }
 0x374   : > { %2501 = vrcp.f32 %v969_v33 }
 0x37b   : > { %v2496_v35 = vpop.eup %2495 }
 0x37c   : > { %v1022_v36 = vmul.f32 %v2496_v35, %v2909_v30 }
 0x37d   : > { %v2498_v13 = vpop.eup %2497 }
 0x37e   : > { %v1023_v31 = vmul.f32 %v2498_v13, %v2911_v6  ;;  %2333 = vmatprep.mubr.msk.f32.mxu1 %vm295_vm0, %v1022_v36 }
 0x37f   : > { %v2500_v32 = vpop.eup %2499 }
 0x380   : > { %2334 = vmatmul.mubr.msk.f32.vlgmr.msra.gmra.mxu1 %vm295_vm0, %v1023_v31  ;;  %v1024_v18 = vmul.f32 %v2500_v32, %v2915_v1 }
 0x381   : > { %v2502_v39 = vpop.eup %2501  ;;  %2354 = vmatpush3.msra.mxu1 %v2815_v55 }
 0x382   : > { %2355 = vmatprep.subr.mxu1 %v2899_v52  ;;  %2336 = vmatprep.mubr.msk.f32.mxu1 %vm295_vm0, %v1024_v18  ;;  %v1025_v41 = vmul.f32 %v2502_v39, %v2919_v5 }
 0x383   : > { %2356 = vmatpush3.msra.mxu1 %v2899_v52 }
 0x384   : > { %2357 = vmatprep.subr.mxu1 %v1259_v23  ;;  %2337 = vmatmul.mubr.msk.f32.gmra.mxu1 %vm295_vm0, %v1025_v41 }
 0x385   : > { %2358 = vmatpush3.msra.mxu1 %v1259_v23  ;;  %v1536_v23 = vld [vmem:[%s3195_s2] sm:$0xff] }
 0x3bb   : > { %v975_v30 = vpop.xlane.xlu0 %974 }
 0x3bc   : > { %2503 = vrcp.f32 %v975_v30 }
 0x3c3   : > { %v987_v6 = vpop.xlane.xlu0 %986 }
 0x3c7   : > { %v972_v22 = vpop.xlane.xlu1 %971 }
 0x3c8   : > { %2505 = vrcp.f32 %v972_v22 }
 0x3c9   : > { %v2504_v25 = vpop.eup %2503 }
 0x3ca   : > { %v1027_v28 = vmul.f32 %v2504_v25, %v2931_v38 }
 0x3cb   : > { %v984_v1 = vpop.xlane.xlu1 %983  ;;  %v981_v21 = vpop.xlane.xlu0 %980 }
 0x3cc   : > { %2507 = vrcp.f32 %v984_v1 }
 0x3cd   : > { %2509 = vrcp.f32 %v987_v6 }
 0x3ce   : > { %2511 = vrcp.f32 %v981_v21 }
 0x3cf   : > { %v978_v55 = vpop.xlane.xlu1 %977  ;;  %v993_v42 = vpop.xlane.xlu0 %992 }
 0x3d0   : > { %2513 = vrcp.f32 %v978_v55 }
 0x3d1   : > { %2515 = vrcp.f32 %v993_v42 }
 0x3d3   : > { %v990_v5 = vpop.xlane.xlu1 %989  ;;  %v999_v52 = vpop.xlane.xlu0 %998 }
 0x3d4   : > { %2517 = vrcp.f32 %v990_v5 }
 0x3d5   : > { %v2506_v44 = vpop.eup %2505  ;;  %2519 = vrcp.f32 %v999_v52 }
 0x3d6   : > { %v1026_v45 = vmul.f32 %v2506_v44, %v2945_v60 }
 0x3d7   : > { %v996_v47 = vpop.xlane.xlu1 %995  ;;  %v1005_v49 = vpop.xlane.xlu0 %1004 }
 0x3d8   : > { %2521 = vrcp.f32 %v996_v47  ;;  %2347 = vmatprep.mubr.msk.f32.mxu0 %vm295_vm0, %v1026_v45 }
 0x3d9   : > { %v2508_v50 = vpop.eup %2507  ;;  %2348 = vmatmul.mubr.msk.f32.vlgmr.msra.gmra.mxu0 %vm295_vm0, %v1027_v28  ;;  %2523 = vrcp.f32 %v1005_v49 }
 0x3da   : > { %v2510_v34 = vpop.eup %2509  ;;  %2368 = vmatpush3.msra.mxu0 %v2818_v57  ;;  %v1030_v54 = vmul.f32 %v2508_v50, %v2947_v61 }
 0x3db   : > { %2369 = vmatprep.subr.mxu0 %v2901_v53  ;;  %v1002_v56 = vpop.xlane.xlu1 %1001  ;;  %v1257_v58 = vpop.permute.xlu0 %1256  ;;  %v1031_v59 = vmul.f32 %v2510_v34, %v2939_v51 }
 0x3dc   : > { %v2512_v38 = vpop.eup %2511  ;;  %2525 = vrcp.f32 %v1002_v56  ;;  %2370 = vmatpush3.msra.mxu0 %v2901_v53  ;;  %2359 = vmatprep.subr.mxu1 %v1257_v58 }
 0x3dd   : > { %v2514_v37 = vpop.eup %2513  ;;  %2361 = vmatprep.mubr.msk.f32.mxu1 %vm295_vm0, %v1030_v54  ;;  %2371 = vmatprep.subr.mxu0 %v2989_v20  ;;  %v1029_v60 = vmul.f32 %v2512_v38, %v2951_v46  ;;  %v3066_v38 = vld [vmem:[%s3198_s5] sm:$0xff] }
 0x3de   : > { %2360 = vmatpush3.msra.mxu1 %v1257_v58  ;;  %2372 = vmatpush3.msra.mxu0 %v2989_v20  ;;  %v1028_v57 = vmul.f32 %v2514_v37, %v2957_v29  ;;  %v2516_v61 = vpop.eup %2515  ;;  %v1542_v58 = vsub.s32 1, %v2650_v9 }
 0x3df   : > { %2362 = vmatmul.mubr.msk.f32.vlgmr.msra.gmra.mxu1 %vm295_vm0, %v1031_v59  ;;  %v1366_v40 = vpop.permute.xlu1 %1365  ;;  %v1033_v43 = vmul.f32 %v2516_v61, %v2959_v3  ;;  %v2552_v61 = vld [vmem:[%s2640_s15 + $0x8] sm:$0xff] }
 0x3e0   : > { %2350 = vmatprep.mubr.msk.f32.mxu0 %vm295_vm0, %v1028_v57  ;;  %2373 = vmatprep.subr.mxu0 %v1366_v40  ;;  %v1543_v37 = vrot.slane %v3066_v38, %v1542_v58 }
 0x3e1   : > { %v2518_v53 = vpop.eup %2517  ;;  %2351 = vmatmul.mubr.msk.f32.gmra.mxu0 %vm295_vm0, %v1029_v60 }
 0x3e2   : > { %2374 = vmatpush3.msra.mxu0 %v1366_v40  ;;  %v1032_v51 = vmul.f32 %v2518_v53, %v2961_v4  ;;  %v2520_v63 = vpop.eup %2519 }
 0x3e3   : > { %v1035_v2 = vmul.f32 %v2520_v63, %v2967_v8  ;;  %v2553_v63 = vld [vmem:[%s2640_s15] sm:$0xff] }
 0x3e4   : > { %2364 = vmatprep.mubr.msk.f32.mxu1 %vm295_vm0, %v1032_v51 }
 0x3e5   : > { %v2522_v0 = vpop.eup %2521  ;;  %2365 = vmatmul.mubr.msk.f32.gmra.mxu1 %vm295_vm0, %v1033_v43 }
 0x3e6   : > { %v1034_v46 = vmul.f32 %v2522_v0, %v2973_v12  ;;  %v2524_v48 = vpop.eup %2523  ;;  %v1539_v12 = vld [vmem:[%s3195_s2 + $0x18] sm:$0xff] }
 0x3e7   : > { %v1037_v3 = vmul.f32 %v2524_v48, %v2975_v14  ;;  %2381 = vmatprep.subr.mxu1 %v1539_v12  ;;  %v1538_v14 = vld [vmem:[%s3195_s2 + $0x10] sm:$0xff] }
 0x3e8   : > { %2375 = vmatprep.mubr.msk.f32.mxu0 %vm295_vm0, %v1034_v46  ;;  %2382 = vmatpush3.msra.mxu1 %v1539_v12 }
 0x3e9   : > { %v2526_v29 = vpop.eup %2525  ;;  %2376 = vmatmul.mubr.msk.f32.vlgmr.msra.gmra.mxu0 %vm295_vm0, %v1035_v2  ;;  %2383 = vmatprep.subr.mxu1 %v1538_v14 }
 0x3ea   : > { %v1036_v4 = vmul.f32 %v2526_v29, %v2981_v17  ;;  %2384 = vmatpush3.msra.mxu1 %v1538_v14  ;;  %v1537_v17 = vld [vmem:[%s3195_s2 + $0x8] sm:$0xff] }
 0x3eb   : > { %2385 = vmatprep.subr.mxu1 %v1537_v17 }
 0x3ec   : > { %2378 = vmatprep.mubr.msk.f32.mxu0 %vm295_vm0, %v1036_v4  ;;  %2386 = vmatpush3.msra.mxu1 %v1537_v17  ;;  %v2554_v4 = vld [vmem:[%s2640_s15 + $0x10] sm:$0xff] }
 0x3ed   : > { %2379 = vmatmul.mubr.msk.f32.gmra.mxu0 %vm295_vm0, %v1037_v3  ;;  %2387 = vmatprep.subr.mxu1 %v1536_v23 }
 0x3ee   : > { %2388 = vmatpush3.msra.mxu1 %v1536_v23 }
 0x440   : > { %v2335_v62 = vpop.f32.mrf.mxu1 }
 0x442   : > { %v1128_v7 = vpop.f32.mrf.mxu1 }
 0x444   : > { %v3031_v10 = vpop.f32.mrf.mxu1 }
 0x446   : > { %v1138_v15 = vpop.f32.mrf.mxu1 }
 0x499   : > { %v2349_v11 = vpop.f32.mrf.mxu0 }
 0x49a   : > { %1480 = vrot.lane.b32.xlu1 %v2349_v11, %s2569_s10 }
 0x49b   : > { %v1237_v8 = vpop.f32.mrf.mxu0 }
 0x49c   : > { %1478 = vrot.lane.b32.xlu0 %v1237_v8, %s2569_s10 }
 0x49f   : > { %v2363_v16 = vpop.f32.mrf.mxu1 }
 0x4a0   : > { %1496 = vrot.lane.b32.xlu1 %v2363_v16, %s2570_s19 }
 0x4a1   : > { %v1346_v19 = vpop.f32.mrf.mxu1  ;;  %v2352_v20 = vpop.f32.mrf.mxu0 }
 0x4a2   : > { %1494 = vrot.lane.b32.xlu0 %v1346_v19, %s2570_s19 }
 0x4a3   : > { %v1247_v24 = vpop.f32.mrf.mxu0 }
 0x4a4   : > { %1484 = vrot.lane.b32.xlu1 %v2352_v20, %s2569_s10 }
 0x4a5   : > { %v2366_v26 = vpop.f32.mrf.mxu1 }
 0x4a6   : > { %1482 = vrot.lane.b32.xlu0 %v1247_v24, %s2569_s10 }
 0x4a7   : > { %v1356_v27 = vpop.f32.mrf.mxu1 }
 0x4a8   : > { %1500 = vrot.lane.b32.xlu1 %v2366_v26, %s2570_s19 }
 0x4a9   : > { %v2377_v33 = vpop.f32.mrf.mxu0 }
 0x4aa   : > { %1498 = vrot.lane.b32.xlu0 %v1356_v27, %s2570_s19 }
 0x4ab   : > { %v1455_v35 = vpop.f32.mrf.mxu0 }
 0x4ac   : > { %1512 = vrot.lane.b32.xlu1 %v2377_v33, %s2571_s22 }
 0x4ad   : > { %v2380_v36 = vpop.f32.mrf.mxu0 }
 0x4ae   : > { %1510 = vrot.lane.b32.xlu0 %v1455_v35, %s2571_s22 }
 0x4af   : > { %v1465_v13 = vpop.f32.mrf.mxu0 }
 0x4b0   : > { %1516 = vrot.lane.b32.xlu1 %v2380_v36, %s2571_s22 }
 0x4b2   : > { %1514 = vrot.lane.b32.xlu0 %v1465_v13, %s2571_s22 }
 0x50c   : > { %v1481_v31 = vpop.permute.xlu1 %1480 }
 0x50d   : > { %v1523_v55 = vsel %vm433_vm1, %v2335_v62, %v1481_v31 }
 0x50e   : > { %v1479_v32 = vpop.permute.xlu0 %1478 }
 0x50f   : > { %v1522_v21 = vsel %vm433_vm1, %v1128_v7, %v1479_v32  ;;  %v2555_v7 = vld [vmem:[%s2640_s15 + $0x18] sm:$0xff] }
 0x512   : > { %v1497_v18 = vpop.permute.xlu1 %1496 }
 0x513   : > { %v1528_v52 = vsel %vm1526_vm2, %v1523_v55, %v1497_v18  ;;  %v1852_v55 = vld [vmem:[%s3197_s4 + $0x68] sm:$0xff] }
 0x514   : > { %v1495_v39 = vpop.permute.xlu0 %1494 }
 0x515   : > { %v1527_v42 = vsel %vm1526_vm2, %v1522_v21, %v1495_v39  ;;  %v1853_v21 = vld [vmem:[%s3197_s4 + $0x70] sm:$0xff] }
 0x516   : > { %v1485_v41 = vpop.permute.xlu1 %1484 }
 0x517   : > { %v1525_v47 = vsel %vm433_vm1, %v3031_v10, %v1485_v41  ;;  %v1717_v41 = vld [vmem:[%s3196_s3 + $0x18] sm:$0xff] }
 0x518   : > { %v1483_v30 = vpop.permute.xlu0 %1482  ;;  %2395 = vmatprep.subr.mxu0 %v1717_v41 }
 0x519   : > { %v1524_v45 = vsel %vm433_vm1, %v1138_v15, %v1483_v30  ;;  %v1716_v30 = vld [vmem:[%s3196_s3 + $0x10] sm:$0xff]  ;;  %2396 = vmatpush3.msra.mxu0 %v1717_v41 }
 0x51a   : > { %v1501_v6 = vpop.permute.xlu1 %1500  ;;  %2397 = vmatprep.subr.mxu0 %v1716_v30 }
 0x51b   : > { %v1530_v34 = vsel %vm1526_vm2, %v1525_v47, %v1501_v6  ;;  %v1715_v6 = vld [vmem:[%s3196_s3 + $0x8] sm:$0xff]  ;;  %2398 = vmatpush3.msra.mxu0 %v1716_v30 }
 0x51c   : > { %v1499_v22 = vpop.permute.xlu0 %1498  ;;  %2399 = vmatprep.subr.mxu0 %v1715_v6 }
 0x51d   : > { %v1529_v49 = vsel %vm1526_vm2, %v1524_v45, %v1499_v22  ;;  %v1714_v22 = vld [vmem:[%s3196_s3] sm:$0xff]  ;;  %2400 = vmatpush3.msra.mxu0 %v1715_v6 }
 0x51e   : > { %v1513_v1 = vpop.permute.xlu1 %1512  ;;  %2401 = vmatprep.subr.mxu0 %v1714_v22 }
 0x51f   : > { %v1533_v44 = vsel %vm1531_vm3, %v1528_v52, %v1513_v1  ;;  %2402 = vmatpush3.msra.mxu0 %v1714_v22  ;;  %v1854_v1 = vld [vmem:[%s3197_s4 + $0x78] sm:$0xff] }
 0x520   : > { %v1511_v5 = vpop.permute.xlu0 %1510  ;;  %2409 = vmatprep.subr.mxu1 %v1854_v1 }
 0x521   : > { %v1532_v25 = vsel %vm1531_vm3, %v1527_v42, %v1511_v5 }
 0x522   : > { %2389 = vmatprep.mubr.msk.f32.mxu1 %vm295_vm0, %v1532_v25  ;;  %v1517_v28 = vpop.permute.xlu1 %1516 }
 0x523   : > { %2390 = vmatmul.mubr.msk.f32.vlgmr.msra.gmra.mxu1 %vm295_vm0, %v1533_v44  ;;  %v1535_v56 = vsel %vm1531_vm3, %v1530_v34, %v1517_v28 }
 0x524   : > { %v1515_v50 = vpop.permute.xlu0 %1514  ;;  %2410 = vmatpush3.msra.mxu1 %v1854_v1 }
 0x525   : > { %v1534_v54 = vsel %vm1531_vm3, %v1529_v49, %v1515_v50  ;;  %2411 = vmatprep.subr.mxu1 %v1853_v21 }
 0x526   : > { %2392 = vmatprep.mubr.msk.f32.mxu1 %vm295_vm0, %v1534_v54  ;;  %2412 = vmatpush3.msra.mxu1 %v1853_v21 }
 0x527   : > { %2393 = vmatmul.mubr.msk.f32.gmra.mxu1 %vm295_vm0, %v1535_v56  ;;  %2413 = vmatprep.subr.mxu1 %v1852_v55  ;;  %v1700_v56 = vsub.s32 4, %v2650_v9 }
 0x528   : > { %2414 = vmatpush3.msra.mxu1 %v1852_v55 }
 0x5e3   : > { %v2391_v59 = vpop.f32.mrf.mxu1 }
 0x5e4   : > { %v1628_v57 = vadd.f32 %v2391_v59, %v1543_v37  ;;  %v1708_v59 = vsub.s32 5, %v2650_v9 }
 0x5e5   : > { %v1622_v40 = vpop.f32.mrf.mxu1 }
 0x5e6   : > { %v1623_v60 = vadd.f32 %v1622_v40, %v1543_v37  ;;  %v1642_v53 = vadd.f32 %v2552_v61, %v1628_v57 }
 0x5e7   : > { %v2394_v51 = vpop.f32.mrf.mxu1 }
 0x5e8   : > { %v1648_v43 = vsel %vm295_vm0, %v1642_v53, 0.0  ;;  %v1641_v0 = vadd.f32 %v2553_v63, %v1623_v60  ;;  %v1638_v2 = vadd.f32 %v2394_v51, %v1543_v37 }
 0x5e9   : > { %1649 = vadd.xlane.f32.xlu1 %v1648_v43  ;;  %v1632_v46 = vpop.f32.mrf.mxu1 }
 0x5ea   : > { %v1633_v48 = vadd.f32 %v1632_v46, %v1543_v37  ;;  %v1645_v29 = vsel %vm295_vm0, %v1641_v0, 0.0  ;;  %v1644_v10 = vadd.f32 %v2555_v7, %v1638_v2  ;;  %v1701_v37 = vrot.slane %v3066_v38, %v1700_v56  ;;  %v1851_v7 = vld [vmem:[%s3197_s4 + $0x60] sm:$0xff] }
 0x5eb   : > { %1646 = vadd.xlane.f32.xlu0 %v1645_v29  ;;  %2415 = vmatprep.subr.mxu1 %v1851_v7 }
 0x5ec   : > { %v1643_v3 = vadd.f32 %v2554_v4, %v1633_v48  ;;  %v1654_v11 = vsel %vm295_vm0, %v1644_v10, 0.0  ;;  %2416 = vmatpush3.msra.mxu1 %v1851_v7 }
 0x5ee   : > { %v1651_v62 = vsel %vm295_vm0, %v1643_v3, 0.0 }
 0x5ef   : > { %1652 = vadd.xlane.f32.xlu0 %v1651_v62 }
 0x5f3   : > { %1655 = vadd.xlane.f32.xlu0 %v1654_v11  ;;  %v1849_v11 = vld [vmem:[%s3197_s4 + $0x50] sm:$0xff] }
 0x672   : > { %v1650_v8 = vpop.xlane.xlu1 %1649 }
 0x673   : > { %v1659_v12 = vmul.f32 0.03125, %v1650_v8  ;;  %v1848_v8 = vld [vmem:[%s3197_s4 + $0x48] sm:$0xff] }
 0x674   : > { %v1647_v15 = vpop.xlane.xlu0 %1646 }
 0x675   : > { %v1663_v14 = vsub.f32 %v1642_v53, %v1659_v12  ;;  %v1658_v16 = vmul.f32 0.03125, %v1647_v15  ;;  %v1709_v53 = vrot.slane %v3066_v38, %v1708_v59  ;;  %v1847_v12 = vld [vmem:[%s3197_s4 + $0x40] sm:$0xff]  ;;  %v1846_v15 = vld [vmem:[%s3197_s4 + $0x38] sm:$0xff] }
 0x677   : > { %v1662_v17 = vsub.f32 %v1641_v0, %v1658_v16  ;;  %v1667_v19 = vmul.f32 %v1663_v14, %v1663_v14  ;;  %v1844_v16 = vld [vmem:[%s3197_s4 + $0x28] sm:$0xff] }
 0x678   : > { %v1653_v20 = vpop.xlane.xlu0 %1652 }
 0x679   : > { %v1660_v23 = vmul.f32 0.03125, %v1653_v20  ;;  %v1673_v24 = vsel %vm295_vm0, %v1667_v19, 0.0  ;;  %v1666_v26 = vmul.f32 %v1662_v17, %v1662_v17  ;;  %v1842_v19 = vld [vmem:[%s3197_s4 + $0x18] sm:$0xff]  ;;  %v1841_v20 = vld [vmem:[%s3197_s4 + $0x10] sm:$0xff] }
 0x67a   : > { %1674 = vadd.xlane.f32.xlu0 %v1673_v24  ;;  %v1839_v24 = vld [vmem:[%s3197_s4] sm:$0xff] }
 0x67b   : > { %v1664_v27 = vsub.f32 %v1643_v3, %v1660_v23  ;;  %v1670_v33 = vsel %vm295_vm0, %v1666_v26, 0.0  ;;  %v1840_v23 = vld [vmem:[%s3197_s4 + $0x8] sm:$0xff]  ;;  %v1720_v26 = vsub.s32 2, %v2650_v9 }
 0x67c   : > { %1671 = vadd.xlane.f32.xlu1 %v1670_v33  ;;  %v1656_v35 = vpop.xlane.xlu0 %1655 }
 0x67d   : > { %v1661_v36 = vmul.f32 0.03125, %v1656_v35  ;;  %v1668_v13 = vmul.f32 %v1664_v27, %v1664_v27 }
 0x67f   : > { %v1665_v31 = vsub.f32 %v1644_v10, %v1661_v36  ;;  %v1676_v32 = vsel %vm295_vm0, %v1668_v13, 0.0  ;;  %v1850_v10 = vld [vmem:[%s3197_s4 + $0x58] sm:$0xff] }
 0x680   : > { %1677 = vadd.xlane.f32.xlu1 %v1676_v32  ;;  %2417 = vmatprep.subr.mxu1 %v1850_v10 }
 0x681   : > { %v1669_v18 = vmul.f32 %v1665_v31, %v1665_v31  ;;  %2418 = vmatpush3.msra.mxu1 %v1850_v10 }
 0x682   : > { %2419 = vmatprep.subr.mxu1 %v1849_v11 }
 0x683   : > { %v1679_v39 = vsel %vm295_vm0, %v1669_v18, 0.0  ;;  %2420 = vmatpush3.msra.mxu1 %v1849_v11 }
 0x684   : > { %1680 = vadd.xlane.f32.xlu0 %v1679_v39  ;;  %2421 = vmatprep.subr.mxu1 %v1848_v8 }
 0x685   : > { %2422 = vmatpush3.msra.mxu1 %v1848_v8 }
 0x686   : > { %2423 = vmatprep.subr.mxu1 %v1847_v12 }
 0x687   : > { %2424 = vmatpush3.msra.mxu1 %v1847_v12 }
 0x688   : > { %2425 = vmatprep.subr.mxu1 %v1846_v15 }
 0x689   : > { %2426 = vmatpush3.msra.mxu1 %v1846_v15 }
 0x703   : > { %v1675_v42 = vpop.xlane.xlu0 %1674 }
 0x704   : > { %v1683_v5 = vmul.f32 0.03125, %v1675_v42 }
 0x705   : > { %v1672_v52 = vpop.xlane.xlu1 %1671 }
 0x706   : > { %v1687_v25 = vadd.f32 1e-05, %v1683_v5  ;;  %v1682_v44 = vmul.f32 0.03125, %v1672_v52 }
 0x708   : > { %2527 = vrsqrt.f32 %v1687_v25  ;;  %v1686_v45 = vadd.f32 1e-05, %v1682_v44 }
 0x709   : > { %v1678_v28 = vpop.xlane.xlu1 %1677 }
 0x70a   : > { %2529 = vrsqrt.f32 %v1686_v45  ;;  %v1684_v47 = vmul.f32 0.03125, %v1678_v28 }
 0x70c   : > { %v1688_v49 = vadd.f32 1e-05, %v1684_v47 }
 0x70d   : > { %v1681_v50 = vpop.xlane.xlu0 %1680 }
 0x70e   : > { %2531 = vrsqrt.f32 %v1688_v49  ;;  %v1685_v34 = vmul.f32 0.03125, %v1681_v50 }
 0x710   : > { %v1689_v54 = vadd.f32 1e-05, %v1685_v34 }
 0x712   : > { %2533 = vrsqrt.f32 %v1689_v54 }
 0x715   : > { %v2528_v58 = vpop.eup %2527 }
 0x716   : > { %v1695_v57 = vmul.f32 %v2528_v58, %v1663_v14  ;;  %v1845_v14 = vld [vmem:[%s3197_s4 + $0x30] sm:$0xff]  ;;  %v1857_v58 = vsub.s32 3, %v2650_v9 }
 0x717   : > { %v2530_v40 = vpop.eup %2529  ;;  %2427 = vmatprep.subr.mxu1 %v1845_v14 }
 0x718   : > { %v1694_v60 = vmul.f32 %v2530_v40, %v1662_v17  ;;  %v1703_v61 = vmul.f32 %v1701_v37, %v1695_v57  ;;  %2428 = vmatpush3.msra.mxu1 %v1845_v14  ;;  %v1843_v17 = vld [vmem:[%s3197_s4 + $0x20] sm:$0xff] }
 0x719   : > { %2429 = vmatprep.subr.mxu1 %v1844_v16 }
 0x71a   : > { %v1702_v51 = vmul.f32 %v1701_v37, %v1694_v60  ;;  %v3108_v46 = vadd.f32 %v1709_v53, %v1703_v61  ;;  %2430 = vmatpush3.msra.mxu1 %v1844_v16 }
 0x71b   : > { %v2532_v43 = vpop.eup %2531  ;;  %2431 = vmatprep.subr.mxu1 %v1843_v17 }
 0x71c   : > { %v3106_v63 = vadd.f32 %v1709_v53, %v1702_v51  ;;  %v1696_v0 = vmul.f32 %v2532_v43, %v1664_v27  ;;  %2432 = vmatpush3.msra.mxu1 %v1843_v17  ;;  %v1721_v27 = vrot.slane %v3066_v38, %v1720_v26 }
 0x71d   : > { %2433 = vmatprep.subr.mxu1 %v1842_v19 }
 0x71e   : > { %2403 = vmatprep.mubr.msk.f32.mxu0 %vm295_vm0, %v3106_v63  ;;  %v1704_v2 = vmul.f32 %v1701_v37, %v1696_v0  ;;  %2434 = vmatpush3.msra.mxu1 %v1842_v19 }
 0x71f   : > { %v2534_v48 = vpop.eup %2533  ;;  %2404 = vmatmul.mubr.msk.f32.vlgmr.msra.gmra.mxu0 %vm295_vm0, %v3108_v46  ;;  %2435 = vmatprep.subr.mxu1 %v1841_v20 }
 0x720   : > { %v3114_v29 = vadd.f32 %v1709_v53, %v1704_v2  ;;  %v1697_v4 = vmul.f32 %v2534_v48, %v1665_v31  ;;  %2436 = vmatpush3.msra.mxu1 %v1841_v20 }
 0x721   : > { %2437 = vmatprep.subr.mxu1 %v1840_v23 }
 0x722   : > { %2406 = vmatprep.mubr.msk.f32.mxu0 %vm295_vm0, %v3114_v29  ;;  %v1705_v3 = vmul.f32 %v1701_v37, %v1697_v4  ;;  %2438 = vmatpush3.msra.mxu1 %v1840_v23  ;;  %v1858_v37 = vrot.slane %v3066_v38, %v1857_v58 }
 0x723   : > { %2439 = vmatprep.subr.mxu1 %v1839_v24 }
 0x724   : > { %v3118_v62 = vadd.f32 %v1709_v53, %v1705_v3  ;;  %2440 = vmatpush3.msra.mxu1 %v1839_v24 }
 0x726   : > { %2407 = vmatmul.mubr.msk.f32.gmra.mxu0 %vm295_vm0, %v3118_v62 }
 0x7df   : > { %v2405_v33 = vpop.f32.mrf.mxu0 }
 0x7e0   : > { %v1806_v35 = vadd.f32 %v2405_v33, %v1721_v27 }
 0x7e1   : > { %v1800_v36 = vpop.f32.mrf.mxu0 }
 0x7e2   : > { %v1824_v13 = vmul.f32 0.70710677, %v1806_v35  ;;  %v1801_v31 = vadd.f32 %v1800_v36, %v1721_v27  ;;  %v1820_v52 = vmul.f32 0.5, %v1806_v35 }
 0x7e4   : > { %2535 = verf.f32 %v1824_v13  ;;  %v1823_v32 = vmul.f32 0.70710677, %v1801_v31  ;;  %v1819_v42 = vmul.f32 0.5, %v1801_v31 }
 0x7e6   : > { %2537 = verf.f32 %v1823_v32  ;;  %v2408_v18 = vpop.f32.mrf.mxu0 }
 0x7e7   : > { %v1816_v39 = vadd.f32 %v2408_v18, %v1721_v27 }
 0x7e8   : > { %v1810_v41 = vpop.f32.mrf.mxu0 }
 0x7e9   : > { %v1826_v30 = vmul.f32 0.70710677, %v1816_v39  ;;  %v1811_v6 = vadd.f32 %v1810_v41, %v1721_v27  ;;  %v1822_v34 = vmul.f32 0.5, %v1816_v39 }
 0x7eb   : > { %2539 = verf.f32 %v1826_v30  ;;  %v1825_v22 = vmul.f32 0.70710677, %v1811_v6  ;;  %v1821_v49 = vmul.f32 0.5, %v1811_v6 }
 0x7ed   : > { %2541 = verf.f32 %v1825_v22 }
 0x7f1   : > { %v2536_v1 = vpop.eup %2535 }
 0x7f2   : > { %v1832_v55 = vadd.f32 1.0, %v2536_v1 }
 0x7f3   : > { %v2538_v21 = vpop.eup %2537 }
 0x7f4   : > { %v1831_v5 = vadd.f32 1.0, %v2538_v21  ;;  %v1836_v44 = vmul.f32 %v1832_v55, %v1820_v52 }
 0x7f6   : > { %v1835_v25 = vmul.f32 %v1831_v5, %v1819_v42  ;;  %v2002_v5 = vsub.s32 6, %v2650_v9 }
 0x7f8   : > { %v2540_v45 = vpop.eup %2539  ;;  %2441 = vmatprep.mubr.f32.mxu1 %v1835_v25  ;;  %v2003_v25 = vrot.slane %v3066_v38, %v2002_v5 }
 0x7f9   : > { %2442 = vmatmul.mubr.f32.vlgmr.msra.gmra.mxu1 %v1836_v44  ;;  %v1834_v47 = vadd.f32 1.0, %v2540_v45  ;;  %v2010_v44 = vsub.s32 7, %v2650_v9 }
 0x7fa   : > { %v2542_v28 = vpop.eup %2541 }
 0x7fb   : > { %v1833_v50 = vadd.f32 1.0, %v2542_v28  ;;  %v1838_v56 = vmul.f32 %v1834_v47, %v1822_v34 }
 0x7fd   : > { %v1837_v54 = vmul.f32 %v1833_v50, %v1821_v49  ;;  %v2011_v49 = vrot.slane %v3066_v38, %v2010_v44 }
 0x7ff   : > { %2444 = vmatprep.mubr.f32.mxu1 %v1837_v54 }
 0x800   : > { %2445 = vmatmul.mubr.f32.gmra.mxu1 %v1838_v56 }
 0x8b9   : > { %v2443_v59 = vpop.f32.mrf.mxu1 }
 0x8ba   : > { %v1931_v57 = vadd.f32 %v2443_v59, %v1858_v37 }
 0x8bb   : > { %v1925_v40 = vpop.f32.mrf.mxu1 }
 0x8bc   : > { %v1945_v60 = vadd.f32 %v1931_v57, %v3108_v46  ;;  %v1926_v61 = vadd.f32 %v1925_v40, %v1858_v37 }
 0x8be   : > { %v1951_v53 = vsel %vm295_vm0, %v1945_v60, 0.0  ;;  %v1944_v51 = vadd.f32 %v1926_v61, %v3106_v63 }
 0x8bf   : > { %1952 = vadd.xlane.f32.xlu0 %v1951_v53 }
 0x8c0   : > { %v2446_v43 = vpop.f32.mrf.mxu1  ;;  %v1948_v0 = vsel %vm295_vm0, %v1944_v51, 0.0 }
 0x8c1   : > { %v1941_v2 = vadd.f32 %v2446_v43, %v1858_v37  ;;  %1949 = vadd.xlane.f32.xlu1 %v1948_v0 }
 0x8c2   : > { %v1935_v48 = vpop.f32.mrf.mxu1 }
 0x8c3   : > { %v1947_v4 = vadd.f32 %v1941_v2, %v3118_v62  ;;  %v1936_v3 = vadd.f32 %v1935_v48, %v1858_v37 }
 0x8c5   : > { %v1957_v7 = vsel %vm295_vm0, %v1947_v4, 0.0  ;;  %v1946_v10 = vadd.f32 %v1936_v3, %v3114_v29 }
 0x8c6   : > { %1958 = vadd.xlane.f32.xlu0 %v1957_v7 }
 0x8c7   : > { %v1954_v46 = vsel %vm295_vm0, %v1946_v10, 0.0 }
 0x8c8   : > { %1955 = vadd.xlane.f32.xlu1 %v1954_v46 }
 0x948   : > { %v1953_v11 = vpop.xlane.xlu0 %1952 }
 0x949   : > { %v1961_v63 = vmul.f32 0.03125, %v1953_v11 }
 0x94a   : > { %v1950_v8 = vpop.xlane.xlu1 %1949 }
 0x94b   : > { %v1965_v12 = vsub.f32 %v1945_v60, %v1961_v63  ;;  %v1960_v15 = vmul.f32 0.03125, %v1950_v8 }
 0x94d   : > { %v1964_v14 = vsub.f32 %v1944_v51, %v1960_v15  ;;  %v1969_v16 = vmul.f32 %v1965_v12, %v1965_v12 }
 0x94f   : > { %v1959_v17 = vpop.xlane.xlu0 %1958  ;;  %v1975_v19 = vsel %vm295_vm0, %v1969_v16, 0.0  ;;  %v1968_v62 = vmul.f32 %v1964_v14, %v1964_v14 }
 0x950   : > { %v1963_v20 = vmul.f32 0.03125, %v1959_v17  ;;  %1976 = vadd.xlane.f32.xlu0 %v1975_v19 }
 0x951   : > { %v1956_v23 = vpop.xlane.xlu1 %1955  ;;  %v1972_v29 = vsel %vm295_vm0, %v1968_v62, 0.0 }
 0x952   : > { %v1967_v24 = vsub.f32 %v1947_v4, %v1963_v20  ;;  %v1962_v26 = vmul.f32 0.03125, %v1956_v23  ;;  %1973 = vadd.xlane.f32.xlu1 %v1972_v29 }
 0x954   : > { %v1966_v27 = vsub.f32 %v1946_v10, %v1962_v26  ;;  %v1971_v33 = vmul.f32 %v1967_v24, %v1967_v24 }
 0x956   : > { %v1981_v35 = vsel %vm295_vm0, %v1971_v33, 0.0  ;;  %v1970_v36 = vmul.f32 %v1966_v27, %v1966_v27 }
 0x957   : > { %1982 = vadd.xlane.f32.xlu0 %v1981_v35 }
 0x958   : > { %v1978_v13 = vsel %vm295_vm0, %v1970_v36, 0.0 }
 0x959   : > { %1979 = vadd.xlane.f32.xlu1 %v1978_v13 }
 0x9d9   : > { %v1977_v31 = vpop.xlane.xlu0 %1976 }
 0x9da   : > { %v1985_v32 = vmul.f32 0.03125, %v1977_v31 }
 0x9db   : > { %v1974_v18 = vpop.xlane.xlu1 %1973 }
 0x9dc   : > { %v1989_v39 = vadd.f32 1e-05, %v1985_v32  ;;  %v1984_v41 = vmul.f32 0.03125, %v1974_v18 }
 0x9de   : > { %2543 = vrsqrt.f32 %v1989_v39  ;;  %v1988_v30 = vadd.f32 1e-05, %v1984_v41 }
 0x9e0   : > { %2545 = vrsqrt.f32 %v1988_v30  ;;  %v1983_v6 = vpop.xlane.xlu0 %1982 }
 0x9e1   : > { %v1987_v22 = vmul.f32 0.03125, %v1983_v6 }
 0x9e2   : > { %v1980_v1 = vpop.xlane.xlu1 %1979 }
 0x9e3   : > { %v1991_v21 = vadd.f32 1e-05, %v1987_v22  ;;  %v1986_v55 = vmul.f32 0.03125, %v1980_v1 }
 0x9e5   : > { %2547 = vrsqrt.f32 %v1991_v21  ;;  %v1990_v42 = vadd.f32 1e-05, %v1986_v55 }
 0x9e7   : > { %2549 = vrsqrt.f32 %v1990_v42 }
 0x9eb   : > { %v2544_v52 = vpop.eup %2543 }
 0x9ec   : > { %v1997_v45 = vmul.f32 %v2544_v52, %v1965_v12 }
 0x9ed   : > { %v2546_v28 = vpop.eup %2545 }
 0x9ee   : > { %v1996_v47 = vmul.f32 %v2546_v28, %v1964_v14  ;;  %v2005_v50 = vmul.f32 %v2003_v25, %v1997_v45 }
 0x9f0   : > { %v2004_v34 = vmul.f32 %v2003_v25, %v1996_v47  ;;  %v2013_v58 = vadd.f32 %v2011_v49, %v2005_v50 }
 0x9f2   : > { %v2548_v54 = vpop.eup %2547  ;;  %v2012_v56 = vadd.f32 %v2011_v49, %v2004_v34  ;;  %2017 = vst.msk [vmem:[%s280_s27 + $0x8] sm:$0xff] %vm295_vm0, %v2013_v58 }
 0x9f3   : > { %v1999_v37 = vmul.f32 %v2548_v54, %v1967_v24 }
 0x9f4   : > { %v2550_v59 = vpop.eup %2549  ;;  %2016 = vst.msk [vmem:[%s280_s27] sm:$0xff] %vm295_vm0, %v2012_v56 }
 0x9f5   : > { %v1998_v9 = vmul.f32 %v2550_v59, %v1966_v27  ;;  %v2007_v57 = vmul.f32 %v2003_v25, %v1999_v37 }
 0x9f7   : > { %v2006_v40 = vmul.f32 %v2003_v25, %v1998_v9  ;;  %v2015_v60 = vadd.f32 %v2011_v49, %v2007_v57 }
 0x9f9   : > { %v2014_v38 = vadd.f32 %v2011_v49, %v2006_v40  ;;  %2019 = vst.msk [vmem:[%s280_s27 + $0x18] sm:$0xff] %vm295_vm0, %v2015_v60 }
 0x9fb   : > { %2018 = vst.msk [vmem:[%s280_s27 + $0x10] sm:$0xff] %vm295_vm0, %v2014_v38 }
 0x9fc PF: > { %s17_s24 = sadd.s32 1, %s2562_s24  }
 0x9fd   : > { %p14_p4 = scmp.ge.s32.totalorder %s17_s24, 4  }
 0x9ff   :  { %16 = sbr.rel (!%p14_p4) target bundleno = 1 (0x1), region = 78 }

</bundles_post_ra>
